<compile_context>
chip_gen: v6e
topology: v6e:2x2x1
jax: 0.10.0
libtpu: 0.0.40
codegen_flags: <defaults>
</compile_context>

<pallas_src>
import math

import jax
import jax.numpy as jnp
from jax.experimental import pallas as pl
from jax.experimental.pallas import tpu as pltpu


STRUCTURE = (96, 64, 96, 64, 96)
INPUT_SIZE = 3 * 32 * 32          # 3072, already a multiple of 128
OUTPUT_SIZE = 10
PAD_WIDTH = 128                   # all layer output widths padded to 128 lanes

_DIMS = (INPUT_SIZE,) + tuple(STRUCTURE) + (OUTPUT_SIZE,)
# Row count of each padded weight block inside the packed slab:
#   layer 0 consumes the raw 3072-wide input; layers 1..5 consume 128-wide padded activations.
_W_ROWS = tuple(INPUT_SIZE if i == 0 else PAD_WIDTH for i in range(len(_DIMS) - 1))
_W_OFFSETS = tuple(int(sum(_W_ROWS[:i])) for i in range(len(_W_ROWS)))
W_TOTAL_ROWS = int(sum(_W_ROWS))  # 3072 + 5*128 = 3712 (multiple of 8)
_N_LAYERS = len(_W_ROWS)


def _round_up(x, m):
    return ((x + m - 1) // m) * m


def _mlp_kernel(x_ref, w_ref, o_ref):
    """Fused forward for one batch tile: 5x (matmul + ReLU) + final matmul.

    x_ref: (TB, 3072)   w_ref: (3712, 128) packed padded weights   o_ref: (TB, 128)
    """
    h = x_ref[...]
    for li in range(_N_LAYERS):
        off, rows = _W_OFFSETS[li], _W_ROWS[li]
        w = w_ref[off:off + rows, :]                      # static, tile-aligned view
        h = jnp.dot(h, w, preferred_element_type=jnp.float32)
        if li < _N_LAYERS - 1:
            h = jnp.maximum(h, 0.0)                       # ReLU on hidden layers only
    o_ref[...] = h                                        # lane-dense (TB, 128) store


def _vmem_limit_bytes(tb):
    tile_bytes = 4 * (tb * INPUT_SIZE + W_TOTAL_ROWS * PAD_WIDTH + tb * PAD_WIDTH)
    # 2x for double buffering + headroom for the f32 activation intermediates.
    return int(min(max(2 * tile_bytes + (4 << 20), 8 << 20), 32 << 20))


def simplenet_forward(x, w_slab, batch_tile=256):
    """x: (B, 3, 32, 32) or (B, 3072). w_slab: (3712, 128) packed padded weights."""
    x2d = x.reshape(-1, INPUT_SIZE).astype(jnp.float32)
    b = x2d.shape[0]

    # Batch tile: sublane-aligned (multiple of 8), capped at `batch_tile` rows.
    tb = min(batch_tile, _round_up(b, 8))
    b_pad = _round_up(b, tb)
    if b_pad != b:
        x2d = jnp.pad(x2d, ((0, b_pad - b), (0, 0)))
    grid = (b_pad // tb,)

    out_padded = pl.pallas_call(
        _mlp_kernel,
        out_shape=jax.ShapeDtypeStruct((b_pad, PAD_WIDTH), jnp.float32),
        grid=grid,
        in_specs=[
            pl.BlockSpec((tb, INPUT_SIZE), lambda i: (i, 0)),
            # Constant index_map -> weight slab DMA'd once and kept resident.
            pl.BlockSpec((W_TOTAL_ROWS, PAD_WIDTH), lambda i: (0, 0)),
        ],
        out_specs=pl.BlockSpec((tb, PAD_WIDTH), lambda i: (i, 0)),
        compiler_params=pltpu.CompilerParams(
            dimension_semantics=("parallel",),            # v7x: split tiles across both TCs
            vmem_limit_bytes=_vmem_limit_bytes(tb),
        ),
    )(x2d, w_slab)

    return out_padded[:b, :OUTPUT_SIZE]


def init_weights(key):
    """nn.Linear-style init U(-1/sqrt(fan_in), +1/sqrt(fan_in)), stored transposed
    as (in_features, out_features) so the kernel computes x @ W == x @ W_torch.T."""
    weights = []
    for i in range(len(_DIMS) - 1):
        fan_in, fan_out = _DIMS[i], _DIMS[i + 1]
        key, sub = jax.random.split(key)
        bound = 1.0 / math.sqrt(fan_in)
        w = jax.random.uniform(
            sub, (fan_in, fan_out), minval=-bound, maxval=bound, dtype=jnp.float32
        )
        weights.append(w)
    return weights


def pack_weights(weights):
    """Zero-pad each (in, out) weight into a (rows_i, 128) block and stack them
    into one tile-aligned (3712, 128) slab.  Padded rows/cols are exactly zero."""
    slab = jnp.zeros((W_TOTAL_ROWS, PAD_WIDTH), dtype=jnp.float32)
    for (off, rows), w in zip(zip(_W_OFFSETS, _W_ROWS), weights):
        fan_in, fan_out = w.shape
        assert fan_in <= rows and fan_out <= PAD_WIDTH
        slab = slab.at[off:off + fan_in, :fan_out].set(w)
    return slab


def _reference_forward(x, weights):
    """Plain-JAX reference (true, unpadded weights)."""
    h = x.reshape(-1, INPUT_SIZE).astype(jnp.float32)
    for w in weights[:-1]:
        h = jnp.maximum(h @ w, 0.0)
    return h @ weights[-1]


if __name__ == "__main__":
    key = jax.random.PRNGKey(0)
    k_x, k_w, k_x2 = jax.random.split(key, 3)

    weights = init_weights(k_w)
    w_slab = pack_weights(weights)

    # Small CIFAR-like batch: (B=2, C=3, H=32, W=32) in NCHW.
    x = jax.random.normal(k_x, (2, 3, 32, 32), dtype=jnp.float32)
    out = jax.block_until_ready(simplenet_forward(x, w_slab))
    ref = _reference_forward(x, weights)
    assert out.shape == (2, OUTPUT_SIZE), out.shape
    assert jnp.allclose(out, ref, atol=2e-3, rtol=2e-3), "mismatch vs reference (small batch)"

    # Exercise the gridded / batch-padded path (non-multiple of the 256-row tile).
    x_big = jax.random.normal(k_x2, (260, 3072), dtype=jnp.float32)
    out_big = jax.block_until_ready(simplenet_forward(x_big, w_slab))
    ref_big = _reference_forward(x_big, weights)
    assert out_big.shape == (260, OUTPUT_SIZE), out_big.shape
    assert jnp.allclose(out_big, ref_big, atol=2e-3, rtol=2e-3), "mismatch vs reference (gridded)"

    print("KERNEL_OK")
</pallas_src>

<mosaic_0001>
module attributes {stable_mosaic.version = 11 : i64} {
  func.func @_mlp_kernel(%arg0: i32, %arg1: memref<8x3072xf32, #tpu.memory_space<vmem>>, %arg2: memref<3712x128xf32, #tpu.memory_space<vmem>>, %arg3: memref<8x128xf32, #tpu.memory_space<vmem>>) attributes {dimension_semantics = [#tpu.dimension_semantics<parallel>], iteration_bounds = array<i64: 1>, scalar_prefetch = 0 : i64, scratch_operands = 0 : i64, tpu.core_type = #tpu.core_type<tc>, window_params = [{transform_indices = @transform_0, window_bounds = array<i64: 8, 3072>}, {pipeline_mode = #tpu.pipeline_mode<synchronous>, transform_indices = @transform_1, window_bounds = array<i64: 3712, 128>}, {transform_indices = @transform_2, window_bounds = array<i64: 8, 128>}]} {
    %c0 = arith.constant 0 : index
    %c0_0 = arith.constant 0 : index
    %0 = vector.load %arg1[%c0, %c0_0] : memref<8x3072xf32, #tpu.memory_space<vmem>>, vector<8x3072xf32>
    %c0_1 = arith.constant 0 : index
    %c0_2 = arith.constant 0 : index
    %1 = vector.load %arg2[%c0_1, %c0_2] : memref<3712x128xf32, #tpu.memory_space<vmem>>, vector<3072x128xf32>
    %cst = arith.constant dense<0.000000e+00> : vector<8x128xf32>
    %2 = tpu.matmul %0, %1, %cst {dimension_numbers = #tpu.dot_dimension_numbers<[1], [0], [0], [1], [0, 0, 1, 1], [], []>} : vector<8x3072xf32>, vector<3072x128xf32>, vector<8x128xf32> -> vector<8x128xf32>
    %cst_3 = arith.constant 0.000000e+00 : f32
    %3 = vector.broadcast %cst_3 : f32 to vector<8x128xf32>
    %4 = arith.maximumf %2, %3 : vector<8x128xf32>
    %c3072 = arith.constant 3072 : index
    %c0_4 = arith.constant 0 : index
    %5 = vector.load %arg2[%c3072, %c0_4] : memref<3712x128xf32, #tpu.memory_space<vmem>>, vector<128x128xf32>
    %cst_5 = arith.constant dense<0.000000e+00> : vector<8x128xf32>
    %6 = tpu.matmul %4, %5, %cst_5 {dimension_numbers = #tpu.dot_dimension_numbers<[1], [0], [0], [1], [0, 0, 1, 1], [], []>} : vector<8x128xf32>, vector<128x128xf32>, vector<8x128xf32> -> vector<8x128xf32>
    %cst_6 = arith.constant 0.000000e+00 : f32
    %7 = vector.broadcast %cst_6 : f32 to vector<8x128xf32>
    %8 = arith.maximumf %6, %7 : vector<8x128xf32>
    %c3200 = arith.constant 3200 : index
    %c0_7 = arith.constant 0 : index
    %9 = vector.load %arg2[%c3200, %c0_7] : memref<3712x128xf32, #tpu.memory_space<vmem>>, vector<128x128xf32>
    %cst_8 = arith.constant dense<0.000000e+00> : vector<8x128xf32>
    %10 = tpu.matmul %8, %9, %cst_8 {dimension_numbers = #tpu.dot_dimension_numbers<[1], [0], [0], [1], [0, 0, 1, 1], [], []>} : vector<8x128xf32>, vector<128x128xf32>, vector<8x128xf32> -> vector<8x128xf32>
    %cst_9 = arith.constant 0.000000e+00 : f32
    %11 = vector.broadcast %cst_9 : f32 to vector<8x128xf32>
    %12 = arith.maximumf %10, %11 : vector<8x128xf32>
    %c3328 = arith.constant 3328 : index
    %c0_10 = arith.constant 0 : index
    %13 = vector.load %arg2[%c3328, %c0_10] : memref<3712x128xf32, #tpu.memory_space<vmem>>, vector<128x128xf32>
    %cst_11 = arith.constant dense<0.000000e+00> : vector<8x128xf32>
    %14 = tpu.matmul %12, %13, %cst_11 {dimension_numbers = #tpu.dot_dimension_numbers<[1], [0], [0], [1], [0, 0, 1, 1], [], []>} : vector<8x128xf32>, vector<128x128xf32>, vector<8x128xf32> -> vector<8x128xf32>
    %cst_12 = arith.constant 0.000000e+00 : f32
    %15 = vector.broadcast %cst_12 : f32 to vector<8x128xf32>
    %16 = arith.maximumf %14, %15 : vector<8x128xf32>
    %c3456 = arith.constant 3456 : index
    %c0_13 = arith.constant 0 : index
    %17 = vector.load %arg2[%c3456, %c0_13] : memref<3712x128xf32, #tpu.memory_space<vmem>>, vector<128x128xf32>
    %cst_14 = arith.constant dense<0.000000e+00> : vector<8x128xf32>
    %18 = tpu.matmul %16, %17, %cst_14 {dimension_numbers = #tpu.dot_dimension_numbers<[1], [0], [0], [1], [0, 0, 1, 1], [], []>} : vector<8x128xf32>, vector<128x128xf32>, vector<8x128xf32> -> vector<8x128xf32>
    %cst_15 = arith.constant 0.000000e+00 : f32
    %19 = vector.broadcast %cst_15 : f32 to vector<8x128xf32>
    %20 = arith.maximumf %18, %19 : vector<8x128xf32>
    %c3584 = arith.constant 3584 : index
    %c0_16 = arith.constant 0 : index
    %21 = vector.load %arg2[%c3584, %c0_16] : memref<3712x128xf32, #tpu.memory_space<vmem>>, vector<128x128xf32>
    %cst_17 = arith.constant dense<0.000000e+00> : vector<8x128xf32>
    %22 = tpu.matmul %20, %21, %cst_17 {dimension_numbers = #tpu.dot_dimension_numbers<[1], [0], [0], [1], [0, 0, 1, 1], [], []>} : vector<8x128xf32>, vector<128x128xf32>, vector<8x128xf32> -> vector<8x128xf32>
    %c0_18 = arith.constant 0 : index
    %c0_19 = arith.constant 0 : index
    %23 = vector.load %arg3[%c0_18, %c0_19] : memref<8x128xf32, #tpu.memory_space<vmem>>, vector<8x128xf32>
    tpu.vector_store %arg3[%c0_18, %c0_19], %22 {strides = array<i32>} : memref<8x128xf32, #tpu.memory_space<vmem>>, vector<8x128xf32>,
    return
  }
  func.func @transform_0(%arg0: i32) -> (i32, i32) {
    %c0_i32 = arith.constant 0 : i32
    %c0_i32_0 = arith.constant 0 : i32
    return %arg0, %c0_i32 : i32, i32
  }
  func.func @transform_1(%arg0: i32) -> (i32, i32) {
    %c0_i32 = arith.constant 0 : i32
    %c0_i32_0 = arith.constant 0 : i32
    %c0_i32_1 = arith.constant 0 : i32
    return %c0_i32, %c0_i32_0 : i32, i32
  }
  func.func @transform_2(%arg0: i32) -> (i32, i32) {
    %c0_i32 = arith.constant 0 : i32
    %c0_i32_0 = arith.constant 0 : i32
    return %arg0, %c0_i32 : i32, i32
  }
}

</mosaic_0001>

<bundles_post_ra>
// kernel: tpu_custom_call.1
= control target key start
LH: loop header
LB: loop body
LE: loop exit
PB: predicated region body
PF: predicated region fallthrough
CT: control target
= control target key end

     0   :  { %7 = vsyncpa [#allocation3], 0  ;;  %s2612_s0 = inlined_call_operand.hbm [shape: f32[8,3072], index: 0, kind: input, shape index: {}]   ;;  %s2613_s1 = inlined_call_operand.hbm [shape: f32[3712,128], index: 1, kind: input, shape index: {}]   ;;  %s2614_s2 = inlined_call_operand.hbm [shape: f32[8,128], index: 2, kind: output, shape index: {}]  }
   0x1   :  { %8 = vsyncpa [#allocation6], 0 }
   0x2   :  { %9 = vsyncpa [#allocation4], 0  ;;  %s2491_s9 = smov [#allocation2]   ;;  %s2492_s11 = smov [#allocation5]  }
   0x3   :  { %s16_s10 = sshll.u32 %s2491_s9, 4  ;;  %s25_s12 = sshll.u32 %s2492_s11, 4  ;;  %s17_s10 = int_to_ptr.vmem [resolvable:$true] %s16_s10  ;;  %s26_s12 = int_to_ptr.vmem [resolvable:$true] %s25_s12 }
   0x4   :  { %s2433_s13 = scalar_lea.vmem %s17_s10, 3072  ;;  %p2438_p1 = scmp.lt.s32.totalorder %s17_s10, %s17_s10 }
   0x5   :  { %p2434_p0 = scmp.ne.s32.totalorder %s17_s10, %s2433_s13  ;;  %p2439_p2 = scmp.lt.s32.totalorder %s2433_s13, %s2433_s13 }
   0x7   :  { %p2440_p3 = por %p2439_p2, %p2438_p1 }
   0x9   :  { %p2441_p4 = pnand %p2440_p3, %p2434_p0 }
   0xb   :  { %2444 = shalt.err (!%p2441_p4)
}
   0xc   :  { %19 = dma.hbm_to_vmem [thread:$0]  %s2612_s0, 3072, %s17_s10, [#allocation3]  }
   0xd   :  { %s2453_s16 = scalar_lea.vmem %s26_s12, 59392  ;;  %p2458_p6 = scmp.lt.s32.totalorder %s26_s12, %s26_s12 }
   0xe   :  { %p2454_p5 = scmp.ne.s32.totalorder %s26_s12, %s2453_s16  ;;  %p2459_p7 = scmp.lt.s32.totalorder %s2453_s16, %s2453_s16 }
  0x10   :  { %p2460_p8 = por %p2459_p7, %p2458_p6 }
  0x12   :  { %p2461_p9 = pnand %p2460_p8, %p2454_p5 }
  0x14   :  { %2464 = shalt.err (!%p2461_p9)
}
  0x15   :  { %s2493_s17 = smov 128   ;;  %s2494_s18 = smov 8  }
  0x16   :  { %31 = dma.hbm_to_vmem [thread:$0]  %s2613_s1, 59392, %s26_s12, [#allocation6], %s2493_s17, %s2493_s17, %s2494_s18  }
  0x17   :  { %2485 = dma.done.wait [#allocation3], 3072  }
  0x18   :  { %2486 = vsyncadd [#allocation3], 4294964224 }
  0x19   :  { %2487 = dma.done.wait [#allocation6], 59392  }
  0x1a   :  { %2488 = vsyncadd [#allocation6], 4294907904  ;;  %v93_v0 = vld [vmem:[#allocation5 + $0xf8] sm:$0xff]  ;;  %v92_v4 = vld [vmem:[#allocation5 + $0xf0] sm:$0xff]  ;;  %vm2496_vm0 = vmmov 0   ;;  %s2497_s0 = smov [#allocation7]  }
  0x1b   :  { %v125_v1 = vld [vmem:[#allocation5 + $0x1f8] sm:$0xff]  ;;  %1738 = vmatprep.subr.mxu0 %v93_v0  ;;  %v124_v5 = vld [vmem:[#allocation5 + $0x1f0] sm:$0xff]  ;;  %v91_v8 = vld [vmem:[#allocation5 + $0xe8] sm:$0xff]  ;;  %s1728_s1 = sshll.u32 %s2497_s0, 4  ;;  %s1729_s1 = int_to_ptr.vmem [resolvable:$true] %s1728_s1 }
  0x1c   :  { %v77_v2 = vld [vmem:[#allocation5 + $0x78] sm:$0xff]  ;;  %1773 = vmatprep.subr.mxu1 %v125_v1  ;;  %v76_v6 = vld [vmem:[#allocation5 + $0x70] sm:$0xff]  ;;  %v123_v9 = vld [vmem:[#allocation5 + $0x1e8] sm:$0xff]  ;;  %s2465_s21 = scalar_lea.vmem %s1729_s1, 128  ;;  %p2470_p11 = scmp.lt.s32.totalorder %s1729_s1, %s1729_s1 }
  0x1d   :  { %v109_v3 = vld [vmem:[#allocation5 + $0x178] sm:$0xff]  ;;  %1739 = vmatpush3.msra.mxu0 %v77_v2  ;;  %v108_v7 = vld [vmem:[#allocation5 + $0x170] sm:$0xff]  ;;  %v75_v10 = vld [vmem:[#allocation5 + $0x68] sm:$0xff]  ;;  %p2466_p10 = scmp.ne.s32.totalorder %s1729_s1, %s2465_s21  ;;  %p2471_p12 = scmp.lt.s32.totalorder %s2465_s21, %s2465_s21 }
  0x1e   :  { %1774 = vmatpush3.msra.mxu1 %v109_v3  ;;  %1740 = vmatprep.subr.mxu0 %v92_v4  ;;  %v107_v11 = vld [vmem:[#allocation5 + $0x168] sm:$0xff]  ;;  %v90_v12 = vld [vmem:[#allocation5 + $0xe0] sm:$0xff]  ;;  %v89_v16 = vld [vmem:[#allocation5 + $0xd8] sm:$0xff] }
  0x1f   :  { %1775 = vmatprep.subr.mxu1 %v124_v5  ;;  %1741 = vmatpush3.msra.mxu0 %v76_v6  ;;  %v122_v13 = vld [vmem:[#allocation5 + $0x1e0] sm:$0xff]  ;;  %v121_v17 = vld [vmem:[#allocation5 + $0x1d8] sm:$0xff]  ;;  %v88_v20 = vld [vmem:[#allocation5 + $0xd0] sm:$0xff]  ;;  %p2472_p13 = por %p2471_p12, %p2470_p11 }
  0x20   :  { %1776 = vmatpush3.msra.mxu1 %v108_v7  ;;  %1742 = vmatprep.subr.mxu0 %v91_v8  ;;  %v74_v14 = vld [vmem:[#allocation5 + $0x60] sm:$0xff]  ;;  %v73_v18 = vld [vmem:[#allocation5 + $0x58] sm:$0xff]  ;;  %v120_v21 = vld [vmem:[#allocation5 + $0x1d0] sm:$0xff] }
  0x21   :  { %1777 = vmatprep.subr.mxu1 %v123_v9  ;;  %v106_v15 = vld [vmem:[#allocation5 + $0x160] sm:$0xff]  ;;  %1743 = vmatpush3.msra.mxu0 %v75_v10  ;;  %v105_v19 = vld [vmem:[#allocation5 + $0x158] sm:$0xff]  ;;  %v72_v22 = vld [vmem:[#allocation5 + $0x50] sm:$0xff]  ;;  %p2473_p0 = pnand %p2472_p13, %p2466_p10 }
  0x22   :  { %1778 = vmatpush3.msra.mxu1 %v107_v11  ;;  %1744 = vmatprep.subr.mxu0 %v90_v12  ;;  %v104_v23 = vld [vmem:[#allocation5 + $0x150] sm:$0xff]  ;;  %v87_v24 = vld [vmem:[#allocation5 + $0xc8] sm:$0xff]  ;;  %v86_v28 = vld [vmem:[#allocation5 + $0xc0] sm:$0xff] }
  0x23   :  { %1779 = vmatprep.subr.mxu1 %v122_v13  ;;  %1745 = vmatpush3.msra.mxu0 %v74_v14  ;;  %v119_v25 = vld [vmem:[#allocation5 + $0x1c8] sm:$0xff]  ;;  %v118_v29 = vld [vmem:[#allocation5 + $0x1c0] sm:$0xff]  ;;  %v85_v32 = vld [vmem:[#allocation5 + $0xb8] sm:$0xff] }
  0x24   :  { %1780 = vmatpush3.msra.mxu1 %v106_v15  ;;  %1746 = vmatprep.subr.mxu0 %v89_v16  ;;  %v71_v26 = vld [vmem:[#allocation5 + $0x48] sm:$0xff]  ;;  %v70_v30 = vld [vmem:[#allocation5 + $0x40] sm:$0xff]  ;;  %v117_v33 = vld [vmem:[#allocation5 + $0x1b8] sm:$0xff] }
  0x25   :  { %1781 = vmatprep.subr.mxu1 %v121_v17  ;;  %1747 = vmatpush3.msra.mxu0 %v73_v18  ;;  %v103_v27 = vld [vmem:[#allocation5 + $0x148] sm:$0xff]  ;;  %v102_v31 = vld [vmem:[#allocation5 + $0x140] sm:$0xff]  ;;  %v69_v34 = vld [vmem:[#allocation5 + $0x38] sm:$0xff] }
  0x26   :  { %1782 = vmatpush3.msra.mxu1 %v105_v19  ;;  %1748 = vmatprep.subr.mxu0 %v88_v20  ;;  %v101_v35 = vld [vmem:[#allocation5 + $0x138] sm:$0xff]  ;;  %v84_v36 = vld [vmem:[#allocation5 + $0xb0] sm:$0xff]  ;;  %v83_v40 = vld [vmem:[#allocation5 + $0xa8] sm:$0xff] }
  0x27   :  { %1783 = vmatprep.subr.mxu1 %v120_v21  ;;  %1749 = vmatpush3.msra.mxu0 %v72_v22  ;;  %v116_v37 = vld [vmem:[#allocation5 + $0x1b0] sm:$0xff]  ;;  %v115_v41 = vld [vmem:[#allocation5 + $0x1a8] sm:$0xff]  ;;  %v82_v44 = vld [vmem:[#allocation5 + $0xa0] sm:$0xff] }
  0x28   :  { %1784 = vmatpush3.msra.mxu1 %v104_v23  ;;  %1750 = vmatprep.subr.mxu0 %v87_v24  ;;  %v68_v38 = vld [vmem:[#allocation5 + $0x30] sm:$0xff]  ;;  %v67_v42 = vld [vmem:[#allocation5 + $0x28] sm:$0xff]  ;;  %v114_v45 = vld [vmem:[#allocation5 + $0x1a0] sm:$0xff] }
  0x29   :  { %1785 = vmatprep.subr.mxu1 %v119_v25  ;;  %1751 = vmatpush3.msra.mxu0 %v71_v26  ;;  %v100_v39 = vld [vmem:[#allocation5 + $0x130] sm:$0xff]  ;;  %v99_v43 = vld [vmem:[#allocation5 + $0x128] sm:$0xff]  ;;  %v66_v46 = vld [vmem:[#allocation5 + $0x20] sm:$0xff] }
  0x2a   :  { %1786 = vmatpush3.msra.mxu1 %v103_v27  ;;  %1752 = vmatprep.subr.mxu0 %v86_v28  ;;  %v98_v47 = vld [vmem:[#allocation5 + $0x120] sm:$0xff]  ;;  %v81_v48 = vld [vmem:[#allocation5 + $0x98] sm:$0xff]  ;;  %v80_v52 = vld [vmem:[#allocation5 + $0x90] sm:$0xff] }
  0x2b   :  { %1787 = vmatprep.subr.mxu1 %v118_v29  ;;  %1753 = vmatpush3.msra.mxu0 %v70_v30  ;;  %v113_v49 = vld [vmem:[#allocation5 + $0x198] sm:$0xff]  ;;  %v112_v53 = vld [vmem:[#allocation5 + $0x190] sm:$0xff]  ;;  %v79_v56 = vld [vmem:[#allocation5 + $0x88] sm:$0xff] }
  0x2c   :  { %1788 = vmatpush3.msra.mxu1 %v102_v31  ;;  %1754 = vmatprep.subr.mxu0 %v85_v32  ;;  %v65_v50 = vld [vmem:[#allocation5 + $0x18] sm:$0xff]  ;;  %v64_v54 = vld [vmem:[#allocation5 + $0x10] sm:$0xff]  ;;  %v111_v57 = vld [vmem:[#allocation5 + $0x188] sm:$0xff] }
  0x2d   :  { %1789 = vmatprep.subr.mxu1 %v117_v33  ;;  %1755 = vmatpush3.msra.mxu0 %v69_v34  ;;  %v97_v51 = vld [vmem:[#allocation5 + $0x118] sm:$0xff]  ;;  %v96_v55 = vld [vmem:[#allocation5 + $0x110] sm:$0xff]  ;;  %v63_v58 = vld [vmem:[#allocation5 + $0x8] sm:$0xff] }
  0x2e   :  { %1790 = vmatpush3.msra.mxu1 %v101_v35  ;;  %1756 = vmatprep.subr.mxu0 %v84_v36  ;;  %v95_v59 = vld [vmem:[#allocation5 + $0x108] sm:$0xff]  ;;  %v78_v60 = vld [vmem:[#allocation5 + $0x80] sm:$0xff]  ;;  %v41_v1 = vld [vmem:[#allocation2 + $0x18] sm:$0xff] }
  0x2f   :  { %1791 = vmatprep.subr.mxu1 %v116_v37  ;;  %1757 = vmatpush3.msra.mxu0 %v68_v38  ;;  %v110_v61 = vld [vmem:[#allocation5 + $0x180] sm:$0xff]  ;;  %v39_v63 = vld [vmem:[#allocation2 + $0x8] sm:$0xff]  ;;  %v40_v3 = vld [vmem:[#allocation2 + $0x10] sm:$0xff] }
  0x30   :  { %1792 = vmatpush3.msra.mxu1 %v100_v39  ;;  %1758 = vmatprep.subr.mxu0 %v83_v40  ;;  %v62_v62 = vld [vmem:[#allocation5] sm:$0xff]  ;;  %v157_v4 = vld [vmem:[#allocation5 + $0x2f8] sm:$0xff]  ;;  %v156_v8 = vld [vmem:[#allocation5 + $0x2f0] sm:$0xff] }
  0x31   :  { %1793 = vmatprep.subr.mxu1 %v115_v41  ;;  %1759 = vmatpush3.msra.mxu0 %v67_v42  ;;  %v94_v0 = vld [vmem:[#allocation5 + $0x100] sm:$0xff]  ;;  %v189_v5 = vld [vmem:[#allocation5 + $0x3f8] sm:$0xff]  ;;  %v188_v9 = vld [vmem:[#allocation5 + $0x3f0] sm:$0xff] }
  0x32   :  { %1794 = vmatpush3.msra.mxu1 %v99_v43  ;;  %1760 = vmatprep.subr.mxu0 %v82_v44  ;;  %v38_v2 = vld [vmem:[#allocation2] sm:$0xff]  ;;  %v141_v6 = vld [vmem:[#allocation5 + $0x278] sm:$0xff]  ;;  %v140_v10 = vld [vmem:[#allocation5 + $0x270] sm:$0xff] }
  0x33   :  { %1795 = vmatprep.subr.mxu1 %v114_v45  ;;  %1761 = vmatpush3.msra.mxu0 %v66_v46  ;;  %v173_v7 = vld [vmem:[#allocation5 + $0x378] sm:$0xff]  ;;  %v172_v11 = vld [vmem:[#allocation5 + $0x370] sm:$0xff]  ;;  %v155_v12 = vld [vmem:[#allocation5 + $0x2e8] sm:$0xff] }
  0x34   :  { %1796 = vmatpush3.msra.mxu1 %v98_v47  ;;  %1762 = vmatprep.subr.mxu0 %v81_v48  ;;  %v187_v13 = vld [vmem:[#allocation5 + $0x3e8] sm:$0xff]  ;;  %v154_v16 = vld [vmem:[#allocation5 + $0x2e0] sm:$0xff]  ;;  %v153_v20 = vld [vmem:[#allocation5 + $0x2d8] sm:$0xff] }
  0x35   :  { %1797 = vmatprep.subr.mxu1 %v113_v49  ;;  %1763 = vmatpush3.msra.mxu0 %v65_v50  ;;  %v139_v14 = vld [vmem:[#allocation5 + $0x268] sm:$0xff]  ;;  %v186_v17 = vld [vmem:[#allocation5 + $0x3e0] sm:$0xff]  ;;  %v185_v21 = vld [vmem:[#allocation5 + $0x3d8] sm:$0xff] }
  0x36   :  { %1798 = vmatpush3.msra.mxu1 %v97_v51  ;;  %1764 = vmatprep.subr.mxu0 %v80_v52  ;;  %v171_v15 = vld [vmem:[#allocation5 + $0x368] sm:$0xff]  ;;  %v138_v18 = vld [vmem:[#allocation5 + $0x260] sm:$0xff]  ;;  %v137_v22 = vld [vmem:[#allocation5 + $0x258] sm:$0xff] }
  0x37   :  { %1799 = vmatprep.subr.mxu1 %v112_v53  ;;  %1765 = vmatpush3.msra.mxu0 %v64_v54  ;;  %v170_v19 = vld [vmem:[#allocation5 + $0x360] sm:$0xff]  ;;  %v169_v23 = vld [vmem:[#allocation5 + $0x358] sm:$0xff]  ;;  %v152_v24 = vld [vmem:[#allocation5 + $0x2d0] sm:$0xff] }
  0x38   :  { %1800 = vmatpush3.msra.mxu1 %v96_v55  ;;  %1766 = vmatprep.subr.mxu0 %v79_v56  ;;  %v184_v25 = vld [vmem:[#allocation5 + $0x3d0] sm:$0xff]  ;;  %v151_v28 = vld [vmem:[#allocation5 + $0x2c8] sm:$0xff]  ;;  %v150_v32 = vld [vmem:[#allocation5 + $0x2c0] sm:$0xff] }
  0x39   :  { %1801 = vmatprep.subr.mxu1 %v111_v57  ;;  %1767 = vmatpush3.msra.mxu0 %v63_v58  ;;  %v136_v26 = vld [vmem:[#allocation5 + $0x250] sm:$0xff]  ;;  %v183_v29 = vld [vmem:[#allocation5 + $0x3c8] sm:$0xff]  ;;  %v182_v33 = vld [vmem:[#allocation5 + $0x3c0] sm:$0xff] }
  0x3a   :  { %1802 = vmatpush3.msra.mxu1 %v95_v59  ;;  %1768 = vmatprep.subr.mxu0 %v78_v60  ;;  %v168_v27 = vld [vmem:[#allocation5 + $0x350] sm:$0xff]  ;;  %v135_v30 = vld [vmem:[#allocation5 + $0x248] sm:$0xff]  ;;  %v134_v34 = vld [vmem:[#allocation5 + $0x240] sm:$0xff] }
  0x3b   :  { %1803 = vmatprep.subr.mxu1 %v110_v61  ;;  %1769 = vmatpush3.msra.mxu0 %v62_v62  ;;  %v167_v31 = vld [vmem:[#allocation5 + $0x348] sm:$0xff]  ;;  %v166_v35 = vld [vmem:[#allocation5 + $0x340] sm:$0xff]  ;;  %v149_v36 = vld [vmem:[#allocation5 + $0x2b8] sm:$0xff] }
  0x3c   :  { %510 = vmatprep.mubr.f32.mxu0 %v39_v63  ;;  %1804 = vmatpush3.msra.mxu1 %v94_v0  ;;  %v181_v37 = vld [vmem:[#allocation5 + $0x3b8] sm:$0xff]  ;;  %v148_v40 = vld [vmem:[#allocation5 + $0x2b0] sm:$0xff]  ;;  %v147_v44 = vld [vmem:[#allocation5 + $0x2a8] sm:$0xff] }
  0x3d   :  { %580 = vmatprep.mubr.f32.mxu1 %v41_v1  ;;  %511 = vmatmul.mubr.f32.vlgmr.msra.gmra.mxu0 %v38_v2  ;;  %v133_v38 = vld [vmem:[#allocation5 + $0x238] sm:$0xff]  ;;  %v180_v41 = vld [vmem:[#allocation5 + $0x3b0] sm:$0xff]  ;;  %v179_v45 = vld [vmem:[#allocation5 + $0x3a8] sm:$0xff] }
  0x3e   :  { %581 = vmatmul.mubr.f32.vlgmr.msra.gmra.mxu1 %v40_v3  ;;  %1808 = vmatprep.subr.mxu0 %v157_v4  ;;  %v165_v39 = vld [vmem:[#allocation5 + $0x338] sm:$0xff]  ;;  %v132_v42 = vld [vmem:[#allocation5 + $0x230] sm:$0xff]  ;;  %v131_v46 = vld [vmem:[#allocation5 + $0x228] sm:$0xff] }
  0x3f   :  { %1843 = vmatprep.subr.mxu1 %v189_v5  ;;  %1809 = vmatpush3.msra.mxu0 %v141_v6  ;;  %v164_v43 = vld [vmem:[#allocation5 + $0x330] sm:$0xff]  ;;  %v163_v47 = vld [vmem:[#allocation5 + $0x328] sm:$0xff]  ;;  %v146_v48 = vld [vmem:[#allocation5 + $0x2a0] sm:$0xff] }
  0x40   :  { %1844 = vmatpush3.msra.mxu1 %v173_v7  ;;  %1810 = vmatprep.subr.mxu0 %v156_v8  ;;  %v178_v49 = vld [vmem:[#allocation5 + $0x3a0] sm:$0xff]  ;;  %v145_v52 = vld [vmem:[#allocation5 + $0x298] sm:$0xff]  ;;  %v144_v56 = vld [vmem:[#allocation5 + $0x290] sm:$0xff] }
  0x41   :  { %1845 = vmatprep.subr.mxu1 %v188_v9  ;;  %1811 = vmatpush3.msra.mxu0 %v140_v10  ;;  %v130_v50 = vld [vmem:[#allocation5 + $0x220] sm:$0xff]  ;;  %v177_v53 = vld [vmem:[#allocation5 + $0x398] sm:$0xff]  ;;  %v176_v57 = vld [vmem:[#allocation5 + $0x390] sm:$0xff] }
  0x42   :  { %1846 = vmatpush3.msra.mxu1 %v172_v11  ;;  %1812 = vmatprep.subr.mxu0 %v155_v12  ;;  %v162_v51 = vld [vmem:[#allocation5 + $0x320] sm:$0xff]  ;;  %v129_v54 = vld [vmem:[#allocation5 + $0x218] sm:$0xff]  ;;  %v128_v58 = vld [vmem:[#allocation5 + $0x210] sm:$0xff] }
  0x43   :  { %1847 = vmatprep.subr.mxu1 %v187_v13  ;;  %1813 = vmatpush3.msra.mxu0 %v139_v14  ;;  %v161_v55 = vld [vmem:[#allocation5 + $0x318] sm:$0xff]  ;;  %v160_v59 = vld [vmem:[#allocation5 + $0x310] sm:$0xff]  ;;  %v143_v60 = vld [vmem:[#allocation5 + $0x288] sm:$0xff] }
  0x44   :  { %1848 = vmatpush3.msra.mxu1 %v171_v15  ;;  %1814 = vmatprep.subr.mxu0 %v154_v16  ;;  %v175_v61 = vld [vmem:[#allocation5 + $0x388] sm:$0xff]  ;;  %v142_v0 = vld [vmem:[#allocation5 + $0x280] sm:$0xff]  ;;  %v45_v6 = vld [vmem:[#allocation2 + $0x38] sm:$0xff] }
  0x45   :  { %1849 = vmatprep.subr.mxu1 %v186_v17  ;;  %1815 = vmatpush3.msra.mxu0 %v138_v18  ;;  %v127_v62 = vld [vmem:[#allocation5 + $0x208] sm:$0xff]  ;;  %v174_v1 = vld [vmem:[#allocation5 + $0x380] sm:$0xff]  ;;  %v221_v7 = vld [vmem:[#allocation5 + $0x4f8] sm:$0xff] }
  0x46   :  { %1850 = vmatpush3.msra.mxu1 %v170_v19  ;;  %1816 = vmatprep.subr.mxu0 %v153_v20  ;;  %v159_v63 = vld [vmem:[#allocation5 + $0x308] sm:$0xff]  ;;  %v126_v2 = vld [vmem:[#allocation5 + $0x200] sm:$0xff]  ;;  %v253_v8 = vld [vmem:[#allocation5 + $0x5f8] sm:$0xff] }
  0x47   :  { %1851 = vmatprep.subr.mxu1 %v185_v21  ;;  %1817 = vmatpush3.msra.mxu0 %v137_v22  ;;  %v43_v3 = vld [vmem:[#allocation2 + $0x28] sm:$0xff]  ;;  %v158_v4 = vld [vmem:[#allocation5 + $0x300] sm:$0xff]  ;;  %v44_v9 = vld [vmem:[#allocation2 + $0x30] sm:$0xff] }
  0x48   :  { %1852 = vmatpush3.msra.mxu1 %v169_v23  ;;  %1818 = vmatprep.subr.mxu0 %v152_v24  ;;  %v42_v5 = vld [vmem:[#allocation2 + $0x20] sm:$0xff]  ;;  %v205_v10 = vld [vmem:[#allocation5 + $0x478] sm:$0xff]  ;;  %v220_v12 = vld [vmem:[#allocation5 + $0x4f0] sm:$0xff] }
  0x49   :  { %1853 = vmatprep.subr.mxu1 %v184_v25  ;;  %1819 = vmatpush3.msra.mxu0 %v136_v26  ;;  %v237_v11 = vld [vmem:[#allocation5 + $0x578] sm:$0xff]  ;;  %v252_v13 = vld [vmem:[#allocation5 + $0x5f0] sm:$0xff]  ;;  %v219_v16 = vld [vmem:[#allocation5 + $0x4e8] sm:$0xff] }
  0x4a   :  { %1854 = vmatpush3.msra.mxu1 %v168_v27  ;;  %1820 = vmatprep.subr.mxu0 %v151_v28  ;;  %v204_v14 = vld [vmem:[#allocation5 + $0x470] sm:$0xff]  ;;  %v251_v17 = vld [vmem:[#allocation5 + $0x5e8] sm:$0xff]  ;;  %v218_v20 = vld [vmem:[#allocation5 + $0x4e0] sm:$0xff] }
  0x4b   :  { %1855 = vmatprep.subr.mxu1 %v183_v29  ;;  %1821 = vmatpush3.msra.mxu0 %v135_v30  ;;  %v236_v15 = vld [vmem:[#allocation5 + $0x570] sm:$0xff]  ;;  %v203_v18 = vld [vmem:[#allocation5 + $0x468] sm:$0xff]  ;;  %v250_v21 = vld [vmem:[#allocation5 + $0x5e0] sm:$0xff] }
  0x4c   :  { %1856 = vmatpush3.msra.mxu1 %v167_v31  ;;  %1822 = vmatprep.subr.mxu0 %v150_v32  ;;  %v235_v19 = vld [vmem:[#allocation5 + $0x568] sm:$0xff]  ;;  %v202_v22 = vld [vmem:[#allocation5 + $0x460] sm:$0xff]  ;;  %v217_v24 = vld [vmem:[#allocation5 + $0x4d8] sm:$0xff] }
  0x4d   :  { %1857 = vmatprep.subr.mxu1 %v182_v33  ;;  %1823 = vmatpush3.msra.mxu0 %v134_v34  ;;  %v234_v23 = vld [vmem:[#allocation5 + $0x560] sm:$0xff]  ;;  %v249_v25 = vld [vmem:[#allocation5 + $0x5d8] sm:$0xff]  ;;  %v216_v28 = vld [vmem:[#allocation5 + $0x4d0] sm:$0xff] }
  0x4e   :  { %1858 = vmatpush3.msra.mxu1 %v166_v35  ;;  %1824 = vmatprep.subr.mxu0 %v149_v36  ;;  %v201_v26 = vld [vmem:[#allocation5 + $0x458] sm:$0xff]  ;;  %v248_v29 = vld [vmem:[#allocation5 + $0x5d0] sm:$0xff]  ;;  %v215_v32 = vld [vmem:[#allocation5 + $0x4c8] sm:$0xff] }
  0x4f   :  { %1859 = vmatprep.subr.mxu1 %v181_v37  ;;  %1825 = vmatpush3.msra.mxu0 %v133_v38  ;;  %v233_v27 = vld [vmem:[#allocation5 + $0x558] sm:$0xff]  ;;  %v200_v30 = vld [vmem:[#allocation5 + $0x450] sm:$0xff]  ;;  %v247_v33 = vld [vmem:[#allocation5 + $0x5c8] sm:$0xff] }
  0x50   :  { %1860 = vmatpush3.msra.mxu1 %v165_v39  ;;  %1826 = vmatprep.subr.mxu0 %v148_v40  ;;  %v232_v31 = vld [vmem:[#allocation5 + $0x550] sm:$0xff]  ;;  %v199_v34 = vld [vmem:[#allocation5 + $0x448] sm:$0xff]  ;;  %v214_v36 = vld [vmem:[#allocation5 + $0x4c0] sm:$0xff] }
  0x51   :  { %1861 = vmatprep.subr.mxu1 %v180_v41  ;;  %1827 = vmatpush3.msra.mxu0 %v132_v42  ;;  %v231_v35 = vld [vmem:[#allocation5 + $0x548] sm:$0xff]  ;;  %v246_v37 = vld [vmem:[#allocation5 + $0x5c0] sm:$0xff]  ;;  %v213_v40 = vld [vmem:[#allocation5 + $0x4b8] sm:$0xff] }
  0x52   :  { %1862 = vmatpush3.msra.mxu1 %v164_v43  ;;  %1828 = vmatprep.subr.mxu0 %v147_v44  ;;  %v198_v38 = vld [vmem:[#allocation5 + $0x440] sm:$0xff]  ;;  %v245_v41 = vld [vmem:[#allocation5 + $0x5b8] sm:$0xff]  ;;  %v212_v44 = vld [vmem:[#allocation5 + $0x4b0] sm:$0xff] }
  0x53   :  { %1863 = vmatprep.subr.mxu1 %v179_v45  ;;  %1829 = vmatpush3.msra.mxu0 %v131_v46  ;;  %v230_v39 = vld [vmem:[#allocation5 + $0x540] sm:$0xff]  ;;  %v197_v42 = vld [vmem:[#allocation5 + $0x438] sm:$0xff]  ;;  %v244_v45 = vld [vmem:[#allocation5 + $0x5b0] sm:$0xff] }
  0x54   :  { %1864 = vmatpush3.msra.mxu1 %v163_v47  ;;  %1830 = vmatprep.subr.mxu0 %v146_v48  ;;  %v229_v43 = vld [vmem:[#allocation5 + $0x538] sm:$0xff]  ;;  %v196_v46 = vld [vmem:[#allocation5 + $0x430] sm:$0xff]  ;;  %v211_v48 = vld [vmem:[#allocation5 + $0x4a8] sm:$0xff] }
  0x55   :  { %1865 = vmatprep.subr.mxu1 %v178_v49  ;;  %1831 = vmatpush3.msra.mxu0 %v130_v50  ;;  %v228_v47 = vld [vmem:[#allocation5 + $0x530] sm:$0xff]  ;;  %v243_v49 = vld [vmem:[#allocation5 + $0x5a8] sm:$0xff] }
  0x56   :  { %1866 = vmatpush3.msra.mxu1 %v162_v51  ;;  %1832 = vmatprep.subr.mxu0 %v145_v52  ;;  %v195_v50 = vld [vmem:[#allocation5 + $0x428] sm:$0xff]  ;;  %v210_v52 = vld [vmem:[#allocation5 + $0x4a0] sm:$0xff] }
  0x57   :  { %1867 = vmatprep.subr.mxu1 %v177_v53  ;;  %1833 = vmatpush3.msra.mxu0 %v129_v54  ;;  %v227_v51 = vld [vmem:[#allocation5 + $0x528] sm:$0xff]  ;;  %v242_v53 = vld [vmem:[#allocation5 + $0x5a0] sm:$0xff] }
  0x58   :  { %1868 = vmatpush3.msra.mxu1 %v161_v55  ;;  %1834 = vmatprep.subr.mxu0 %v144_v56  ;;  %v194_v54 = vld [vmem:[#allocation5 + $0x420] sm:$0xff]  ;;  %v209_v56 = vld [vmem:[#allocation5 + $0x498] sm:$0xff] }
  0x59   :  { %1869 = vmatprep.subr.mxu1 %v176_v57  ;;  %1835 = vmatpush3.msra.mxu0 %v128_v58  ;;  %v226_v55 = vld [vmem:[#allocation5 + $0x520] sm:$0xff]  ;;  %v241_v57 = vld [vmem:[#allocation5 + $0x598] sm:$0xff] }
  0x5a   :  { %1870 = vmatpush3.msra.mxu1 %v160_v59  ;;  %1836 = vmatprep.subr.mxu0 %v143_v60  ;;  %v193_v58 = vld [vmem:[#allocation5 + $0x418] sm:$0xff]  ;;  %v208_v60 = vld [vmem:[#allocation5 + $0x490] sm:$0xff] }
  0x5b   :  { %1871 = vmatprep.subr.mxu1 %v175_v61  ;;  %1837 = vmatpush3.msra.mxu0 %v127_v62  ;;  %v225_v59 = vld [vmem:[#allocation5 + $0x518] sm:$0xff]  ;;  %v240_v61 = vld [vmem:[#allocation5 + $0x590] sm:$0xff] }
  0x5c   :  { %1872 = vmatpush3.msra.mxu1 %v159_v63  ;;  %1838 = vmatprep.subr.mxu0 %v142_v0  ;;  %v192_v62 = vld [vmem:[#allocation5 + $0x410] sm:$0xff]  ;;  %v207_v0 = vld [vmem:[#allocation5 + $0x488] sm:$0xff] }
  0x5d   :  { %1873 = vmatprep.subr.mxu1 %v174_v1  ;;  %1839 = vmatpush3.msra.mxu0 %v126_v2  ;;  %v224_v63 = vld [vmem:[#allocation5 + $0x510] sm:$0xff]  ;;  %v239_v1 = vld [vmem:[#allocation5 + $0x588] sm:$0xff] }
  0x5e   :  { %650 = vmatprep.mubr.f32.mxu0 %v43_v3  ;;  %1874 = vmatpush3.msra.mxu1 %v158_v4  ;;  %v191_v2 = vld [vmem:[#allocation5 + $0x408] sm:$0xff]  ;;  %v206_v4 = vld [vmem:[#allocation5 + $0x480] sm:$0xff] }
  0x5f   :  { %651 = vmatmul.mubr.f32.vlgmr.msra.gmra.mxu0 %v42_v5  ;;  %720 = vmatprep.mubr.f32.mxu1 %v45_v6  ;;  %v223_v3 = vld [vmem:[#allocation5 + $0x508] sm:$0xff]  ;;  %v238_v5 = vld [vmem:[#allocation5 + $0x580] sm:$0xff] }
  0x60   :  { %1878 = vmatprep.subr.mxu0 %v221_v7  ;;  %1913 = vmatprep.subr.mxu1 %v253_v8  ;;  %v190_v6 = vld [vmem:[#allocation5 + $0x400] sm:$0xff]  ;;  %v47_v7 = vld [vmem:[#allocation2 + $0x48] sm:$0xff] }
  0x61   :  { %721 = vmatmul.mubr.f32.vlgmr.msra.gmra.mxu1 %v44_v9  ;;  %1879 = vmatpush3.msra.mxu0 %v205_v10  ;;  %v222_v8 = vld [vmem:[#allocation5 + $0x500] sm:$0xff]  ;;  %v49_v10 = vld [vmem:[#allocation2 + $0x58] sm:$0xff] }
  0x62   :  { %1914 = vmatpush3.msra.mxu1 %v237_v11  ;;  %1880 = vmatprep.subr.mxu0 %v220_v12  ;;  %v46_v9 = vld [vmem:[#allocation2 + $0x40] sm:$0xff]  ;;  %v285_v11 = vld [vmem:[#allocation5 + $0x6f8] sm:$0xff] }
  0x63   :  { %1915 = vmatprep.subr.mxu1 %v252_v13  ;;  %1881 = vmatpush3.msra.mxu0 %v204_v14  ;;  %v317_v12 = vld [vmem:[#allocation5 + $0x7f8] sm:$0xff]  ;;  %v48_v13 = vld [vmem:[#allocation2 + $0x50] sm:$0xff] }
  0x64   :  { %1916 = vmatpush3.msra.mxu1 %v236_v15  ;;  %1882 = vmatprep.subr.mxu0 %v219_v16  ;;  %v269_v14 = vld [vmem:[#allocation5 + $0x678] sm:$0xff]  ;;  %v284_v16 = vld [vmem:[#allocation5 + $0x6f0] sm:$0xff] }
  0x65   :  { %1917 = vmatprep.subr.mxu1 %v251_v17  ;;  %1883 = vmatpush3.msra.mxu0 %v203_v18  ;;  %v301_v15 = vld [vmem:[#allocation5 + $0x778] sm:$0xff]  ;;  %v316_v17 = vld [vmem:[#allocation5 + $0x7f0] sm:$0xff] }
  0x66   :  { %1918 = vmatpush3.msra.mxu1 %v235_v19  ;;  %1884 = vmatprep.subr.mxu0 %v218_v20  ;;  %v268_v18 = vld [vmem:[#allocation5 + $0x670] sm:$0xff]  ;;  %v283_v20 = vld [vmem:[#allocation5 + $0x6e8] sm:$0xff] }
  0x67   :  { %1919 = vmatprep.subr.mxu1 %v250_v21  ;;  %1885 = vmatpush3.msra.mxu0 %v202_v22  ;;  %v300_v19 = vld [vmem:[#allocation5 + $0x770] sm:$0xff]  ;;  %v315_v21 = vld [vmem:[#allocation5 + $0x7e8] sm:$0xff] }
  0x68   :  { %1920 = vmatpush3.msra.mxu1 %v234_v23  ;;  %1886 = vmatprep.subr.mxu0 %v217_v24  ;;  %v267_v22 = vld [vmem:[#allocation5 + $0x668] sm:$0xff]  ;;  %v282_v24 = vld [vmem:[#allocation5 + $0x6e0] sm:$0xff] }
  0x69   :  { %1921 = vmatprep.subr.mxu1 %v249_v25  ;;  %1887 = vmatpush3.msra.mxu0 %v201_v26  ;;  %v299_v23 = vld [vmem:[#allocation5 + $0x768] sm:$0xff]  ;;  %v314_v25 = vld [vmem:[#allocation5 + $0x7e0] sm:$0xff] }
  0x6a   :  { %1922 = vmatpush3.msra.mxu1 %v233_v27  ;;  %1888 = vmatprep.subr.mxu0 %v216_v28  ;;  %v266_v26 = vld [vmem:[#allocation5 + $0x660] sm:$0xff]  ;;  %v281_v28 = vld [vmem:[#allocation5 + $0x6d8] sm:$0xff] }
  0x6b   :  { %1923 = vmatprep.subr.mxu1 %v248_v29  ;;  %1889 = vmatpush3.msra.mxu0 %v200_v30  ;;  %v298_v27 = vld [vmem:[#allocation5 + $0x760] sm:$0xff]  ;;  %v313_v29 = vld [vmem:[#allocation5 + $0x7d8] sm:$0xff] }
  0x6c   :  { %1924 = vmatpush3.msra.mxu1 %v232_v31  ;;  %1890 = vmatprep.subr.mxu0 %v215_v32  ;;  %v265_v30 = vld [vmem:[#allocation5 + $0x658] sm:$0xff]  ;;  %v280_v32 = vld [vmem:[#allocation5 + $0x6d0] sm:$0xff] }
  0x6d   :  { %1925 = vmatprep.subr.mxu1 %v247_v33  ;;  %1891 = vmatpush3.msra.mxu0 %v199_v34  ;;  %v297_v31 = vld [vmem:[#allocation5 + $0x758] sm:$0xff]  ;;  %v312_v33 = vld [vmem:[#allocation5 + $0x7d0] sm:$0xff] }
  0x6e   :  { %1926 = vmatpush3.msra.mxu1 %v231_v35  ;;  %1892 = vmatprep.subr.mxu0 %v214_v36  ;;  %v264_v34 = vld [vmem:[#allocation5 + $0x650] sm:$0xff]  ;;  %v279_v36 = vld [vmem:[#allocation5 + $0x6c8] sm:$0xff] }
  0x6f   :  { %1927 = vmatprep.subr.mxu1 %v246_v37  ;;  %1893 = vmatpush3.msra.mxu0 %v198_v38  ;;  %v296_v35 = vld [vmem:[#allocation5 + $0x750] sm:$0xff]  ;;  %v311_v37 = vld [vmem:[#allocation5 + $0x7c8] sm:$0xff] }
  0x70   :  { %1928 = vmatpush3.msra.mxu1 %v230_v39  ;;  %1894 = vmatprep.subr.mxu0 %v213_v40  ;;  %v263_v38 = vld [vmem:[#allocation5 + $0x648] sm:$0xff]  ;;  %v278_v40 = vld [vmem:[#allocation5 + $0x6c0] sm:$0xff] }
  0x71   :  { %1929 = vmatprep.subr.mxu1 %v245_v41  ;;  %1895 = vmatpush3.msra.mxu0 %v197_v42  ;;  %v295_v39 = vld [vmem:[#allocation5 + $0x748] sm:$0xff]  ;;  %v310_v41 = vld [vmem:[#allocation5 + $0x7c0] sm:$0xff] }
  0x72   :  { %1930 = vmatpush3.msra.mxu1 %v229_v43  ;;  %1896 = vmatprep.subr.mxu0 %v212_v44  ;;  %v262_v42 = vld [vmem:[#allocation5 + $0x640] sm:$0xff]  ;;  %v277_v44 = vld [vmem:[#allocation5 + $0x6b8] sm:$0xff] }
  0x73   :  { %1931 = vmatprep.subr.mxu1 %v244_v45  ;;  %1897 = vmatpush3.msra.mxu0 %v196_v46  ;;  %v294_v43 = vld [vmem:[#allocation5 + $0x740] sm:$0xff]  ;;  %v309_v45 = vld [vmem:[#allocation5 + $0x7b8] sm:$0xff] }
  0x74   :  { %1932 = vmatpush3.msra.mxu1 %v228_v47  ;;  %1898 = vmatprep.subr.mxu0 %v211_v48  ;;  %v261_v46 = vld [vmem:[#allocation5 + $0x638] sm:$0xff]  ;;  %v276_v48 = vld [vmem:[#allocation5 + $0x6b0] sm:$0xff] }
  0x75   :  { %1933 = vmatprep.subr.mxu1 %v243_v49  ;;  %1899 = vmatpush3.msra.mxu0 %v195_v50  ;;  %v293_v47 = vld [vmem:[#allocation5 + $0x738] sm:$0xff]  ;;  %v308_v49 = vld [vmem:[#allocation5 + $0x7b0] sm:$0xff] }
  0x76   :  { %1934 = vmatpush3.msra.mxu1 %v227_v51  ;;  %1900 = vmatprep.subr.mxu0 %v210_v52  ;;  %v260_v50 = vld [vmem:[#allocation5 + $0x630] sm:$0xff]  ;;  %v275_v52 = vld [vmem:[#allocation5 + $0x6a8] sm:$0xff] }
  0x77   :  { %1935 = vmatprep.subr.mxu1 %v242_v53  ;;  %1901 = vmatpush3.msra.mxu0 %v194_v54  ;;  %v292_v51 = vld [vmem:[#allocation5 + $0x730] sm:$0xff]  ;;  %v307_v53 = vld [vmem:[#allocation5 + $0x7a8] sm:$0xff] }
  0x78   :  { %1936 = vmatpush3.msra.mxu1 %v226_v55  ;;  %1902 = vmatprep.subr.mxu0 %v209_v56  ;;  %v259_v54 = vld [vmem:[#allocation5 + $0x628] sm:$0xff]  ;;  %v274_v56 = vld [vmem:[#allocation5 + $0x6a0] sm:$0xff] }
  0x79   :  { %1937 = vmatprep.subr.mxu1 %v241_v57  ;;  %1903 = vmatpush3.msra.mxu0 %v193_v58  ;;  %v291_v55 = vld [vmem:[#allocation5 + $0x728] sm:$0xff]  ;;  %v306_v57 = vld [vmem:[#allocation5 + $0x7a0] sm:$0xff] }
  0x7a   :  { %1938 = vmatpush3.msra.mxu1 %v225_v59  ;;  %1904 = vmatprep.subr.mxu0 %v208_v60  ;;  %v258_v58 = vld [vmem:[#allocation5 + $0x620] sm:$0xff]  ;;  %v273_v60 = vld [vmem:[#allocation5 + $0x698] sm:$0xff] }
  0x7b   :  { %1939 = vmatprep.subr.mxu1 %v240_v61  ;;  %1905 = vmatpush3.msra.mxu0 %v192_v62  ;;  %v290_v59 = vld [vmem:[#allocation5 + $0x720] sm:$0xff]  ;;  %v305_v61 = vld [vmem:[#allocation5 + $0x798] sm:$0xff] }
  0x7c   :  { %1940 = vmatpush3.msra.mxu1 %v224_v63  ;;  %1906 = vmatprep.subr.mxu0 %v207_v0  ;;  %v257_v62 = vld [vmem:[#allocation5 + $0x618] sm:$0xff]  ;;  %v272_v0 = vld [vmem:[#allocation5 + $0x690] sm:$0xff] }
  0x7d   :  { %1941 = vmatprep.subr.mxu1 %v239_v1  ;;  %1907 = vmatpush3.msra.mxu0 %v191_v2  ;;  %v289_v63 = vld [vmem:[#allocation5 + $0x718] sm:$0xff]  ;;  %v304_v1 = vld [vmem:[#allocation5 + $0x790] sm:$0xff] }
  0x7e   :  { %1942 = vmatpush3.msra.mxu1 %v223_v3  ;;  %1908 = vmatprep.subr.mxu0 %v206_v4  ;;  %v256_v2 = vld [vmem:[#allocation5 + $0x610] sm:$0xff]  ;;  %v271_v4 = vld [vmem:[#allocation5 + $0x688] sm:$0xff] }
  0x7f   :  { %1943 = vmatprep.subr.mxu1 %v238_v5  ;;  %1909 = vmatpush3.msra.mxu0 %v190_v6  ;;  %v288_v3 = vld [vmem:[#allocation5 + $0x710] sm:$0xff]  ;;  %v303_v5 = vld [vmem:[#allocation5 + $0x788] sm:$0xff] }
  0x80   :  { %790 = vmatprep.mubr.f32.mxu0 %v47_v7  ;;  %1944 = vmatpush3.msra.mxu1 %v222_v8  ;;  %v255_v6 = vld [vmem:[#allocation5 + $0x608] sm:$0xff]  ;;  %v270_v8 = vld [vmem:[#allocation5 + $0x680] sm:$0xff] }
  0x81   :  { %791 = vmatmul.mubr.f32.vlgmr.msra.gmra.mxu0 %v46_v9  ;;  %860 = vmatprep.mubr.f32.mxu1 %v49_v10  ;;  %v287_v7 = vld [vmem:[#allocation5 + $0x708] sm:$0xff]  ;;  %v302_v9 = vld [vmem:[#allocation5 + $0x780] sm:$0xff] }
  0x82   :  { %1948 = vmatprep.subr.mxu0 %v285_v11  ;;  %1983 = vmatprep.subr.mxu1 %v317_v12  ;;  %v254_v10 = vld [vmem:[#allocation5 + $0x600] sm:$0xff]  ;;  %v51_v11 = vld [vmem:[#allocation2 + $0x68] sm:$0xff] }
  0x83   :  { %861 = vmatmul.mubr.f32.vlgmr.msra.gmra.mxu1 %v48_v13  ;;  %1949 = vmatpush3.msra.mxu0 %v269_v14  ;;  %v286_v12 = vld [vmem:[#allocation5 + $0x700] sm:$0xff]  ;;  %v53_v14 = vld [vmem:[#allocation2 + $0x78] sm:$0xff] }
  0x84   :  { %1984 = vmatpush3.msra.mxu1 %v301_v15  ;;  %1950 = vmatprep.subr.mxu0 %v284_v16  ;;  %v50_v13 = vld [vmem:[#allocation2 + $0x60] sm:$0xff]  ;;  %v349_v15 = vld [vmem:[#allocation5 + $0x8f8] sm:$0xff] }
  0x85   :  { %1985 = vmatprep.subr.mxu1 %v316_v17  ;;  %1951 = vmatpush3.msra.mxu0 %v268_v18  ;;  %v381_v16 = vld [vmem:[#allocation5 + $0x9f8] sm:$0xff]  ;;  %v52_v17 = vld [vmem:[#allocation2 + $0x70] sm:$0xff] }
  0x86   :  { %1986 = vmatpush3.msra.mxu1 %v300_v19  ;;  %1952 = vmatprep.subr.mxu0 %v283_v20  ;;  %v333_v18 = vld [vmem:[#allocation5 + $0x878] sm:$0xff]  ;;  %v348_v20 = vld [vmem:[#allocation5 + $0x8f0] sm:$0xff] }
  0x87   :  { %1987 = vmatprep.subr.mxu1 %v315_v21  ;;  %1953 = vmatpush3.msra.mxu0 %v267_v22  ;;  %v365_v19 = vld [vmem:[#allocation5 + $0x978] sm:$0xff]  ;;  %v380_v21 = vld [vmem:[#allocation5 + $0x9f0] sm:$0xff] }
  0x88   :  { %1988 = vmatpush3.msra.mxu1 %v299_v23  ;;  %1954 = vmatprep.subr.mxu0 %v282_v24  ;;  %v332_v22 = vld [vmem:[#allocation5 + $0x870] sm:$0xff]  ;;  %v347_v24 = vld [vmem:[#allocation5 + $0x8e8] sm:$0xff] }
  0x89   :  { %1989 = vmatprep.subr.mxu1 %v314_v25  ;;  %1955 = vmatpush3.msra.mxu0 %v266_v26  ;;  %v364_v23 = vld [vmem:[#allocation5 + $0x970] sm:$0xff]  ;;  %v379_v25 = vld [vmem:[#allocation5 + $0x9e8] sm:$0xff] }
  0x8a   :  { %1990 = vmatpush3.msra.mxu1 %v298_v27  ;;  %1956 = vmatprep.subr.mxu0 %v281_v28  ;;  %v331_v26 = vld [vmem:[#allocation5 + $0x868] sm:$0xff]  ;;  %v346_v28 = vld [vmem:[#allocation5 + $0x8e0] sm:$0xff] }
  0x8b   :  { %1991 = vmatprep.subr.mxu1 %v313_v29  ;;  %1957 = vmatpush3.msra.mxu0 %v265_v30  ;;  %v363_v27 = vld [vmem:[#allocation5 + $0x968] sm:$0xff]  ;;  %v378_v29 = vld [vmem:[#allocation5 + $0x9e0] sm:$0xff] }
  0x8c   :  { %1992 = vmatpush3.msra.mxu1 %v297_v31  ;;  %1958 = vmatprep.subr.mxu0 %v280_v32  ;;  %v330_v30 = vld [vmem:[#allocation5 + $0x860] sm:$0xff]  ;;  %v345_v32 = vld [vmem:[#allocation5 + $0x8d8] sm:$0xff] }
  0x8d   :  { %1993 = vmatprep.subr.mxu1 %v312_v33  ;;  %1959 = vmatpush3.msra.mxu0 %v264_v34  ;;  %v362_v31 = vld [vmem:[#allocation5 + $0x960] sm:$0xff]  ;;  %v377_v33 = vld [vmem:[#allocation5 + $0x9d8] sm:$0xff] }
  0x8e   :  { %1994 = vmatpush3.msra.mxu1 %v296_v35  ;;  %1960 = vmatprep.subr.mxu0 %v279_v36  ;;  %v329_v34 = vld [vmem:[#allocation5 + $0x858] sm:$0xff]  ;;  %v344_v36 = vld [vmem:[#allocation5 + $0x8d0] sm:$0xff] }
  0x8f   :  { %1995 = vmatprep.subr.mxu1 %v311_v37  ;;  %1961 = vmatpush3.msra.mxu0 %v263_v38  ;;  %v361_v35 = vld [vmem:[#allocation5 + $0x958] sm:$0xff]  ;;  %v376_v37 = vld [vmem:[#allocation5 + $0x9d0] sm:$0xff] }
  0x90   :  { %1996 = vmatpush3.msra.mxu1 %v295_v39  ;;  %1962 = vmatprep.subr.mxu0 %v278_v40  ;;  %v328_v38 = vld [vmem:[#allocation5 + $0x850] sm:$0xff]  ;;  %v343_v40 = vld [vmem:[#allocation5 + $0x8c8] sm:$0xff] }
  0x91   :  { %1997 = vmatprep.subr.mxu1 %v310_v41  ;;  %1963 = vmatpush3.msra.mxu0 %v262_v42  ;;  %v360_v39 = vld [vmem:[#allocation5 + $0x950] sm:$0xff]  ;;  %v375_v41 = vld [vmem:[#allocation5 + $0x9c8] sm:$0xff] }
  0x92   :  { %1998 = vmatpush3.msra.mxu1 %v294_v43  ;;  %1964 = vmatprep.subr.mxu0 %v277_v44  ;;  %v327_v42 = vld [vmem:[#allocation5 + $0x848] sm:$0xff]  ;;  %v342_v44 = vld [vmem:[#allocation5 + $0x8c0] sm:$0xff] }
  0x93   :  { %1999 = vmatprep.subr.mxu1 %v309_v45  ;;  %1965 = vmatpush3.msra.mxu0 %v261_v46  ;;  %v359_v43 = vld [vmem:[#allocation5 + $0x948] sm:$0xff]  ;;  %v374_v45 = vld [vmem:[#allocation5 + $0x9c0] sm:$0xff] }
  0x94   :  { %2000 = vmatpush3.msra.mxu1 %v293_v47  ;;  %1966 = vmatprep.subr.mxu0 %v276_v48  ;;  %v326_v46 = vld [vmem:[#allocation5 + $0x840] sm:$0xff]  ;;  %v341_v48 = vld [vmem:[#allocation5 + $0x8b8] sm:$0xff] }
  0x95   :  { %2001 = vmatprep.subr.mxu1 %v308_v49  ;;  %1967 = vmatpush3.msra.mxu0 %v260_v50  ;;  %v358_v47 = vld [vmem:[#allocation5 + $0x940] sm:$0xff]  ;;  %v373_v49 = vld [vmem:[#allocation5 + $0x9b8] sm:$0xff] }
  0x96   :  { %2002 = vmatpush3.msra.mxu1 %v292_v51  ;;  %1968 = vmatprep.subr.mxu0 %v275_v52  ;;  %v325_v50 = vld [vmem:[#allocation5 + $0x838] sm:$0xff]  ;;  %v340_v52 = vld [vmem:[#allocation5 + $0x8b0] sm:$0xff] }
  0x97   :  { %2003 = vmatprep.subr.mxu1 %v307_v53  ;;  %1969 = vmatpush3.msra.mxu0 %v259_v54  ;;  %v357_v51 = vld [vmem:[#allocation5 + $0x938] sm:$0xff]  ;;  %v372_v53 = vld [vmem:[#allocation5 + $0x9b0] sm:$0xff] }
  0x98   :  { %2004 = vmatpush3.msra.mxu1 %v291_v55  ;;  %1970 = vmatprep.subr.mxu0 %v274_v56  ;;  %v324_v54 = vld [vmem:[#allocation5 + $0x830] sm:$0xff]  ;;  %v339_v56 = vld [vmem:[#allocation5 + $0x8a8] sm:$0xff] }
  0x99   :  { %2005 = vmatprep.subr.mxu1 %v306_v57  ;;  %1971 = vmatpush3.msra.mxu0 %v258_v58  ;;  %v356_v55 = vld [vmem:[#allocation5 + $0x930] sm:$0xff]  ;;  %v371_v57 = vld [vmem:[#allocation5 + $0x9a8] sm:$0xff] }
  0x9a   :  { %2006 = vmatpush3.msra.mxu1 %v290_v59  ;;  %1972 = vmatprep.subr.mxu0 %v273_v60  ;;  %v323_v58 = vld [vmem:[#allocation5 + $0x828] sm:$0xff]  ;;  %v338_v60 = vld [vmem:[#allocation5 + $0x8a0] sm:$0xff] }
  0x9b   :  { %2007 = vmatprep.subr.mxu1 %v305_v61  ;;  %1973 = vmatpush3.msra.mxu0 %v257_v62  ;;  %v355_v59 = vld [vmem:[#allocation5 + $0x928] sm:$0xff]  ;;  %v370_v61 = vld [vmem:[#allocation5 + $0x9a0] sm:$0xff] }
  0x9c   :  { %2008 = vmatpush3.msra.mxu1 %v289_v63  ;;  %1974 = vmatprep.subr.mxu0 %v272_v0  ;;  %v322_v62 = vld [vmem:[#allocation5 + $0x820] sm:$0xff]  ;;  %v337_v0 = vld [vmem:[#allocation5 + $0x898] sm:$0xff] }
  0x9d   :  { %2009 = vmatprep.subr.mxu1 %v304_v1  ;;  %1975 = vmatpush3.msra.mxu0 %v256_v2  ;;  %v354_v63 = vld [vmem:[#allocation5 + $0x920] sm:$0xff]  ;;  %v369_v1 = vld [vmem:[#allocation5 + $0x998] sm:$0xff] }
  0x9e   :  { %2010 = vmatpush3.msra.mxu1 %v288_v3  ;;  %1976 = vmatprep.subr.mxu0 %v271_v4  ;;  %v321_v2 = vld [vmem:[#allocation5 + $0x818] sm:$0xff]  ;;  %v336_v4 = vld [vmem:[#allocation5 + $0x890] sm:$0xff] }
  0x9f   :  { %2011 = vmatprep.subr.mxu1 %v303_v5  ;;  %1977 = vmatpush3.msra.mxu0 %v255_v6  ;;  %v353_v3 = vld [vmem:[#allocation5 + $0x918] sm:$0xff]  ;;  %v368_v5 = vld [vmem:[#allocation5 + $0x990] sm:$0xff] }
  0xa0   :  { %2012 = vmatpush3.msra.mxu1 %v287_v7  ;;  %1978 = vmatprep.subr.mxu0 %v270_v8  ;;  %v320_v6 = vld [vmem:[#allocation5 + $0x810] sm:$0xff]  ;;  %v335_v8 = vld [vmem:[#allocation5 + $0x888] sm:$0xff] }
  0xa1   :  { %2013 = vmatprep.subr.mxu1 %v302_v9  ;;  %1979 = vmatpush3.msra.mxu0 %v254_v10  ;;  %v352_v7 = vld [vmem:[#allocation5 + $0x910] sm:$0xff]  ;;  %v367_v9 = vld [vmem:[#allocation5 + $0x988] sm:$0xff] }
  0xa2   :  { %930 = vmatprep.mubr.f32.mxu0 %v51_v11  ;;  %2014 = vmatpush3.msra.mxu1 %v286_v12  ;;  %v319_v10 = vld [vmem:[#allocation5 + $0x808] sm:$0xff]  ;;  %v334_v12 = vld [vmem:[#allocation5 + $0x880] sm:$0xff] }
  0xa3   :  { %931 = vmatmul.mubr.f32.vlgmr.msra.gmra.mxu0 %v50_v13  ;;  %1000 = vmatprep.mubr.f32.mxu1 %v53_v14  ;;  %v351_v11 = vld [vmem:[#allocation5 + $0x908] sm:$0xff]  ;;  %v366_v13 = vld [vmem:[#allocation5 + $0x980] sm:$0xff] }
  0xa4   :  { %2018 = vmatprep.subr.mxu0 %v349_v15  ;;  %2053 = vmatprep.subr.mxu1 %v381_v16  ;;  %v318_v14 = vld [vmem:[#allocation5 + $0x800] sm:$0xff]  ;;  %v55_v15 = vld [vmem:[#allocation2 + $0x88] sm:$0xff] }
  0xa5   :  { %1001 = vmatmul.mubr.f32.vlgmr.msra.gmra.mxu1 %v52_v17  ;;  %2019 = vmatpush3.msra.mxu0 %v333_v18  ;;  %v350_v16 = vld [vmem:[#allocation5 + $0x900] sm:$0xff]  ;;  %v57_v18 = vld [vmem:[#allocation2 + $0x98] sm:$0xff] }
  0xa6   :  { %2054 = vmatpush3.msra.mxu1 %v365_v19  ;;  %2020 = vmatprep.subr.mxu0 %v348_v20  ;;  %v54_v17 = vld [vmem:[#allocation2 + $0x80] sm:$0xff]  ;;  %v413_v19 = vld [vmem:[#allocation5 + $0xaf8] sm:$0xff] }
  0xa7   :  { %2055 = vmatprep.subr.mxu1 %v380_v21  ;;  %2021 = vmatpush3.msra.mxu0 %v332_v22  ;;  %v445_v20 = vld [vmem:[#allocation5 + $0xbf8] sm:$0xff]  ;;  %v56_v21 = vld [vmem:[#allocation2 + $0x90] sm:$0xff] }
  0xa8   :  { %2056 = vmatpush3.msra.mxu1 %v364_v23  ;;  %2022 = vmatprep.subr.mxu0 %v347_v24  ;;  %v397_v22 = vld [vmem:[#allocation5 + $0xa78] sm:$0xff]  ;;  %v412_v24 = vld [vmem:[#allocation5 + $0xaf0] sm:$0xff] }
  0xa9   :  { %2057 = vmatprep.subr.mxu1 %v379_v25  ;;  %2023 = vmatpush3.msra.mxu0 %v331_v26  ;;  %v429_v23 = vld [vmem:[#allocation5 + $0xb78] sm:$0xff]  ;;  %v444_v25 = vld [vmem:[#allocation5 + $0xbf0] sm:$0xff] }
  0xaa   :  { %2058 = vmatpush3.msra.mxu1 %v363_v27  ;;  %2024 = vmatprep.subr.mxu0 %v346_v28  ;;  %v396_v26 = vld [vmem:[#allocation5 + $0xa70] sm:$0xff]  ;;  %v411_v28 = vld [vmem:[#allocation5 + $0xae8] sm:$0xff] }
  0xab   :  { %2059 = vmatprep.subr.mxu1 %v378_v29  ;;  %2025 = vmatpush3.msra.mxu0 %v330_v30  ;;  %v428_v27 = vld [vmem:[#allocation5 + $0xb70] sm:$0xff]  ;;  %v443_v29 = vld [vmem:[#allocation5 + $0xbe8] sm:$0xff] }
  0xac   :  { %2060 = vmatpush3.msra.mxu1 %v362_v31  ;;  %2026 = vmatprep.subr.mxu0 %v345_v32  ;;  %v395_v30 = vld [vmem:[#allocation5 + $0xa68] sm:$0xff]  ;;  %v410_v32 = vld [vmem:[#allocation5 + $0xae0] sm:$0xff] }
  0xad   :  { %2061 = vmatprep.subr.mxu1 %v377_v33  ;;  %2027 = vmatpush3.msra.mxu0 %v329_v34  ;;  %v427_v31 = vld [vmem:[#allocation5 + $0xb68] sm:$0xff]  ;;  %v442_v33 = vld [vmem:[#allocation5 + $0xbe0] sm:$0xff] }
  0xae   :  { %2062 = vmatpush3.msra.mxu1 %v361_v35  ;;  %2028 = vmatprep.subr.mxu0 %v344_v36  ;;  %v394_v34 = vld [vmem:[#allocation5 + $0xa60] sm:$0xff]  ;;  %v409_v36 = vld [vmem:[#allocation5 + $0xad8] sm:$0xff] }
  0xaf   :  { %2063 = vmatprep.subr.mxu1 %v376_v37  ;;  %2029 = vmatpush3.msra.mxu0 %v328_v38  ;;  %v426_v35 = vld [vmem:[#allocation5 + $0xb60] sm:$0xff]  ;;  %v441_v37 = vld [vmem:[#allocation5 + $0xbd8] sm:$0xff] }
  0xb0   :  { %2064 = vmatpush3.msra.mxu1 %v360_v39  ;;  %2030 = vmatprep.subr.mxu0 %v343_v40  ;;  %v393_v38 = vld [vmem:[#allocation5 + $0xa58] sm:$0xff]  ;;  %v408_v40 = vld [vmem:[#allocation5 + $0xad0] sm:$0xff] }
  0xb1   :  { %2065 = vmatprep.subr.mxu1 %v375_v41  ;;  %2031 = vmatpush3.msra.mxu0 %v327_v42  ;;  %v425_v39 = vld [vmem:[#allocation5 + $0xb58] sm:$0xff]  ;;  %v440_v41 = vld [vmem:[#allocation5 + $0xbd0] sm:$0xff] }
  0xb2   :  { %2066 = vmatpush3.msra.mxu1 %v359_v43  ;;  %2032 = vmatprep.subr.mxu0 %v342_v44  ;;  %v392_v42 = vld [vmem:[#allocation5 + $0xa50] sm:$0xff]  ;;  %v407_v44 = vld [vmem:[#allocation5 + $0xac8] sm:$0xff] }
  0xb3   :  { %2067 = vmatprep.subr.mxu1 %v374_v45  ;;  %2033 = vmatpush3.msra.mxu0 %v326_v46  ;;  %v424_v43 = vld [vmem:[#allocation5 + $0xb50] sm:$0xff]  ;;  %v439_v45 = vld [vmem:[#allocation5 + $0xbc8] sm:$0xff] }
  0xb4   :  { %2068 = vmatpush3.msra.mxu1 %v358_v47  ;;  %2034 = vmatprep.subr.mxu0 %v341_v48  ;;  %v391_v46 = vld [vmem:[#allocation5 + $0xa48] sm:$0xff]  ;;  %v406_v48 = vld [vmem:[#allocation5 + $0xac0] sm:$0xff] }
  0xb5   :  { %2069 = vmatprep.subr.mxu1 %v373_v49  ;;  %2035 = vmatpush3.msra.mxu0 %v325_v50  ;;  %v423_v47 = vld [vmem:[#allocation5 + $0xb48] sm:$0xff]  ;;  %v438_v49 = vld [vmem:[#allocation5 + $0xbc0] sm:$0xff] }
  0xb6   :  { %2070 = vmatpush3.msra.mxu1 %v357_v51  ;;  %2036 = vmatprep.subr.mxu0 %v340_v52  ;;  %v390_v50 = vld [vmem:[#allocation5 + $0xa40] sm:$0xff]  ;;  %v405_v52 = vld [vmem:[#allocation5 + $0xab8] sm:$0xff] }
  0xb7   :  { %2071 = vmatprep.subr.mxu1 %v372_v53  ;;  %2037 = vmatpush3.msra.mxu0 %v324_v54  ;;  %v422_v51 = vld [vmem:[#allocation5 + $0xb40] sm:$0xff]  ;;  %v437_v53 = vld [vmem:[#allocation5 + $0xbb8] sm:$0xff] }
  0xb8   :  { %2072 = vmatpush3.msra.mxu1 %v356_v55  ;;  %2038 = vmatprep.subr.mxu0 %v339_v56  ;;  %v389_v54 = vld [vmem:[#allocation5 + $0xa38] sm:$0xff]  ;;  %v404_v56 = vld [vmem:[#allocation5 + $0xab0] sm:$0xff] }
  0xb9   :  { %2073 = vmatprep.subr.mxu1 %v371_v57  ;;  %2039 = vmatpush3.msra.mxu0 %v323_v58  ;;  %v421_v55 = vld [vmem:[#allocation5 + $0xb38] sm:$0xff]  ;;  %v436_v57 = vld [vmem:[#allocation5 + $0xbb0] sm:$0xff] }
  0xba   :  { %2074 = vmatpush3.msra.mxu1 %v355_v59  ;;  %2040 = vmatprep.subr.mxu0 %v338_v60  ;;  %v388_v58 = vld [vmem:[#allocation5 + $0xa30] sm:$0xff]  ;;  %v403_v60 = vld [vmem:[#allocation5 + $0xaa8] sm:$0xff] }
  0xbb   :  { %2075 = vmatprep.subr.mxu1 %v370_v61  ;;  %2041 = vmatpush3.msra.mxu0 %v322_v62  ;;  %v420_v59 = vld [vmem:[#allocation5 + $0xb30] sm:$0xff]  ;;  %v435_v61 = vld [vmem:[#allocation5 + $0xba8] sm:$0xff] }
  0xbc   :  { %2076 = vmatpush3.msra.mxu1 %v354_v63  ;;  %2042 = vmatprep.subr.mxu0 %v337_v0  ;;  %v387_v62 = vld [vmem:[#allocation5 + $0xa28] sm:$0xff]  ;;  %v402_v0 = vld [vmem:[#allocation5 + $0xaa0] sm:$0xff] }
  0xbd   :  { %2077 = vmatprep.subr.mxu1 %v369_v1  ;;  %2043 = vmatpush3.msra.mxu0 %v321_v2  ;;  %v419_v63 = vld [vmem:[#allocation5 + $0xb28] sm:$0xff]  ;;  %v434_v1 = vld [vmem:[#allocation5 + $0xba0] sm:$0xff] }
  0xbe   :  { %2078 = vmatpush3.msra.mxu1 %v353_v3  ;;  %2044 = vmatprep.subr.mxu0 %v336_v4  ;;  %v386_v2 = vld [vmem:[#allocation5 + $0xa20] sm:$0xff]  ;;  %v401_v4 = vld [vmem:[#allocation5 + $0xa98] sm:$0xff] }
  0xbf   :  { %2079 = vmatprep.subr.mxu1 %v368_v5  ;;  %2045 = vmatpush3.msra.mxu0 %v320_v6  ;;  %v418_v3 = vld [vmem:[#allocation5 + $0xb20] sm:$0xff]  ;;  %v433_v5 = vld [vmem:[#allocation5 + $0xb98] sm:$0xff] }
  0xc0   :  { %2080 = vmatpush3.msra.mxu1 %v352_v7  ;;  %2046 = vmatprep.subr.mxu0 %v335_v8  ;;  %v385_v6 = vld [vmem:[#allocation5 + $0xa18] sm:$0xff]  ;;  %v400_v8 = vld [vmem:[#allocation5 + $0xa90] sm:$0xff] }
  0xc1   :  { %2081 = vmatprep.subr.mxu1 %v367_v9  ;;  %2047 = vmatpush3.msra.mxu0 %v319_v10  ;;  %v417_v7 = vld [vmem:[#allocation5 + $0xb18] sm:$0xff]  ;;  %v432_v9 = vld [vmem:[#allocation5 + $0xb90] sm:$0xff] }
  0xc2   :  { %2082 = vmatpush3.msra.mxu1 %v351_v11  ;;  %2048 = vmatprep.subr.mxu0 %v334_v12  ;;  %v384_v10 = vld [vmem:[#allocation5 + $0xa10] sm:$0xff]  ;;  %v399_v12 = vld [vmem:[#allocation5 + $0xa88] sm:$0xff] }
  0xc3   :  { %2083 = vmatprep.subr.mxu1 %v366_v13  ;;  %2049 = vmatpush3.msra.mxu0 %v318_v14  ;;  %v416_v11 = vld [vmem:[#allocation5 + $0xb10] sm:$0xff]  ;;  %v431_v13 = vld [vmem:[#allocation5 + $0xb88] sm:$0xff] }
  0xc4   :  { %1070 = vmatprep.mubr.f32.mxu0 %v55_v15  ;;  %2084 = vmatpush3.msra.mxu1 %v350_v16  ;;  %v383_v14 = vld [vmem:[#allocation5 + $0xa08] sm:$0xff]  ;;  %v398_v16 = vld [vmem:[#allocation5 + $0xa80] sm:$0xff] }
  0xc5   :  { %1071 = vmatmul.mubr.f32.vlgmr.msra.gmra.mxu0 %v54_v17  ;;  %1140 = vmatprep.mubr.f32.mxu1 %v57_v18  ;;  %v415_v15 = vld [vmem:[#allocation5 + $0xb08] sm:$0xff]  ;;  %v430_v17 = vld [vmem:[#allocation5 + $0xb80] sm:$0xff] }
  0xc6   :  { %2088 = vmatprep.subr.mxu0 %v413_v19  ;;  %2123 = vmatprep.subr.mxu1 %v445_v20  ;;  %v382_v18 = vld [vmem:[#allocation5 + $0xa00] sm:$0xff]  ;;  %v59_v19 = vld [vmem:[#allocation2 + $0xa8] sm:$0xff] }
  0xc7   :  { %1141 = vmatmul.mubr.f32.vlgmr.msra.gmra.mxu1 %v56_v21  ;;  %2089 = vmatpush3.msra.mxu0 %v397_v22  ;;  %v414_v20 = vld [vmem:[#allocation5 + $0xb00] sm:$0xff]  ;;  %v61_v21 = vld [vmem:[#allocation2 + $0xb8] sm:$0xff] }
  0xc8   :  { %2124 = vmatpush3.msra.mxu1 %v429_v23  ;;  %2090 = vmatprep.subr.mxu0 %v412_v24  ;;  %v58_v22 = vld [vmem:[#allocation2 + $0xa0] sm:$0xff]  ;;  %v60_v23 = vld [vmem:[#allocation2 + $0xb0] sm:$0xff]  ;;  %v1302_v24 = vld [vmem:[#allocation5 + $0xc78] sm:$0xff] }
  0xc9   :  { %2125 = vmatprep.subr.mxu1 %v444_v25  ;;  %2091 = vmatpush3.msra.mxu0 %v396_v26  ;;  %v2495_v25 = vmov 0.0   ;;  %v1301_v26 = vld [vmem:[#allocation5 + $0xc70] sm:$0xff] }
  0xca   :  { %2126 = vmatpush3.msra.mxu1 %v428_v27  ;;  %2092 = vmatprep.subr.mxu0 %v411_v28  ;;  %v1300_v27 = vld [vmem:[#allocation5 + $0xc68] sm:$0xff]  ;;  %v1299_v28 = vld [vmem:[#allocation5 + $0xc60] sm:$0xff] }
  0xcb   :  { %2127 = vmatprep.subr.mxu1 %v443_v29  ;;  %2093 = vmatpush3.msra.mxu0 %v395_v30  ;;  %v1298_v29 = vld [vmem:[#allocation5 + $0xc58] sm:$0xff]  ;;  %v1297_v30 = vld [vmem:[#allocation5 + $0xc50] sm:$0xff] }
  0xcc   :  { %2128 = vmatpush3.msra.mxu1 %v427_v31  ;;  %2094 = vmatprep.subr.mxu0 %v410_v32  ;;  %v1296_v31 = vld [vmem:[#allocation5 + $0xc48] sm:$0xff]  ;;  %v1295_v32 = vld [vmem:[#allocation5 + $0xc40] sm:$0xff] }
  0xcd   :  { %2129 = vmatprep.subr.mxu1 %v442_v33  ;;  %2095 = vmatpush3.msra.mxu0 %v394_v34  ;;  %v1294_v33 = vld [vmem:[#allocation5 + $0xc38] sm:$0xff]  ;;  %v1293_v34 = vld [vmem:[#allocation5 + $0xc30] sm:$0xff] }
  0xce   :  { %2130 = vmatpush3.msra.mxu1 %v426_v35  ;;  %2096 = vmatprep.subr.mxu0 %v409_v36  ;;  %v1292_v35 = vld [vmem:[#allocation5 + $0xc28] sm:$0xff]  ;;  %v1291_v36 = vld [vmem:[#allocation5 + $0xc20] sm:$0xff] }
  0xcf   :  { %2131 = vmatprep.subr.mxu1 %v441_v37  ;;  %2097 = vmatpush3.msra.mxu0 %v393_v38  ;;  %v1290_v37 = vld [vmem:[#allocation5 + $0xc18] sm:$0xff]  ;;  %v1289_v38 = vld [vmem:[#allocation5 + $0xc10] sm:$0xff] }
  0xd0   :  { %2132 = vmatpush3.msra.mxu1 %v425_v39  ;;  %2098 = vmatprep.subr.mxu0 %v408_v40  ;;  %v1288_v39 = vld [vmem:[#allocation5 + $0xc08] sm:$0xff]  ;;  %v1287_v40 = vld [vmem:[#allocation5 + $0xc00] sm:$0xff] }
  0xd1   :  { %2133 = vmatprep.subr.mxu1 %v440_v41  ;;  %2099 = vmatpush3.msra.mxu0 %v392_v42  ;;  %v1389_v41 = vld [vmem:[#allocation5 + $0xcf8] sm:$0xff]  ;;  %v1388_v42 = vld [vmem:[#allocation5 + $0xcf0] sm:$0xff] }
  0xd2   :  { %2134 = vmatpush3.msra.mxu1 %v424_v43  ;;  %2100 = vmatprep.subr.mxu0 %v407_v44  ;;  %v1387_v43 = vld [vmem:[#allocation5 + $0xce8] sm:$0xff]  ;;  %v1386_v44 = vld [vmem:[#allocation5 + $0xce0] sm:$0xff] }
  0xd3   :  { %2135 = vmatprep.subr.mxu1 %v439_v45  ;;  %2101 = vmatpush3.msra.mxu0 %v391_v46  ;;  %v1385_v45 = vld [vmem:[#allocation5 + $0xcd8] sm:$0xff]  ;;  %v1384_v46 = vld [vmem:[#allocation5 + $0xcd0] sm:$0xff] }
  0xd4   :  { %2136 = vmatpush3.msra.mxu1 %v423_v47  ;;  %2102 = vmatprep.subr.mxu0 %v406_v48  ;;  %v1383_v47 = vld [vmem:[#allocation5 + $0xcc8] sm:$0xff]  ;;  %v1382_v48 = vld [vmem:[#allocation5 + $0xcc0] sm:$0xff] }
  0xd5   :  { %2137 = vmatprep.subr.mxu1 %v438_v49  ;;  %2103 = vmatpush3.msra.mxu0 %v390_v50  ;;  %v1381_v49 = vld [vmem:[#allocation5 + $0xcb8] sm:$0xff]  ;;  %v1380_v50 = vld [vmem:[#allocation5 + $0xcb0] sm:$0xff] }
  0xd6   :  { %2138 = vmatpush3.msra.mxu1 %v422_v51  ;;  %2104 = vmatprep.subr.mxu0 %v405_v52  ;;  %v1379_v51 = vld [vmem:[#allocation5 + $0xca8] sm:$0xff]  ;;  %v1378_v52 = vld [vmem:[#allocation5 + $0xca0] sm:$0xff] }
  0xd7   :  { %2139 = vmatprep.subr.mxu1 %v437_v53  ;;  %2105 = vmatpush3.msra.mxu0 %v389_v54  ;;  %v1377_v53 = vld [vmem:[#allocation5 + $0xc98] sm:$0xff]  ;;  %v1376_v54 = vld [vmem:[#allocation5 + $0xc90] sm:$0xff] }
  0xd8   :  { %2140 = vmatpush3.msra.mxu1 %v421_v55  ;;  %2106 = vmatprep.subr.mxu0 %v404_v56 }
  0xd9   :  { %2141 = vmatprep.subr.mxu1 %v436_v57  ;;  %2107 = vmatpush3.msra.mxu0 %v388_v58 }
  0xda   :  { %2142 = vmatpush3.msra.mxu1 %v420_v59  ;;  %2108 = vmatprep.subr.mxu0 %v403_v60 }
  0xdb   :  { %2143 = vmatprep.subr.mxu1 %v435_v61  ;;  %2109 = vmatpush3.msra.mxu0 %v387_v62 }
  0xdc   :  { %2144 = vmatpush3.msra.mxu1 %v419_v63  ;;  %2110 = vmatprep.subr.mxu0 %v402_v0 }
  0xdd   :  { %2145 = vmatprep.subr.mxu1 %v434_v1  ;;  %2111 = vmatpush3.msra.mxu0 %v386_v2 }
  0xde   :  { %2146 = vmatpush3.msra.mxu1 %v418_v3  ;;  %2112 = vmatprep.subr.mxu0 %v401_v4 }
  0xdf   :  { %2147 = vmatprep.subr.mxu1 %v433_v5  ;;  %2113 = vmatpush3.msra.mxu0 %v385_v6 }
  0xe0   :  { %2148 = vmatpush3.msra.mxu1 %v417_v7  ;;  %2114 = vmatprep.subr.mxu0 %v400_v8 }
  0xe1   :  { %2149 = vmatprep.subr.mxu1 %v432_v9  ;;  %2115 = vmatpush3.msra.mxu0 %v384_v10 }
  0xe2   :  { %2150 = vmatpush3.msra.mxu1 %v416_v11  ;;  %2116 = vmatprep.subr.mxu0 %v399_v12 }
  0xe3   :  { %2151 = vmatprep.subr.mxu1 %v431_v13  ;;  %2117 = vmatpush3.msra.mxu0 %v383_v14 }
  0xe4   :  { %2152 = vmatpush3.msra.mxu1 %v415_v15  ;;  %2118 = vmatprep.subr.mxu0 %v398_v16 }
  0xe5   :  { %2153 = vmatprep.subr.mxu1 %v430_v17  ;;  %2119 = vmatpush3.msra.mxu0 %v382_v18 }
  0xe6   :  { %1210 = vmatprep.mubr.f32.mxu0 %v59_v19  ;;  %2154 = vmatpush3.msra.mxu1 %v414_v20 }
  0xe7   :  { %1280 = vmatprep.mubr.f32.mxu1 %v61_v21  ;;  %1211 = vmatmul.mubr.f32.vlgmr.msra.gmra.mxu0 %v58_v22 }
  0xe8   :  { %1281 = vmatmul.mubr.f32.vlgmr.msra.gmra.mxu1 %v60_v23  ;;  %2243 = vmatprep.subr.mxu0 %v2495_v25 }
  0xe9   :  { %2278 = vmatprep.subr.mxu1 %v2495_v25  ;;  %2244 = vmatpush3.msra.mxu0 %v1302_v24 }
  0xea   :  { %2245 = vmatprep.subr.mxu0 %v2495_v25  ;;  %2275 = vmatprep.mubr.msk.f32.mxu0 %vm2496_vm0, %v2495_v25 }
  0xeb   :  { %2246 = vmatpush3.msra.mxu0 %v1301_v26  ;;  %2310 = vmatprep.mubr.msk.f32.mxu1 %vm2496_vm0, %v2495_v25 }
  0xec   :  { %2247 = vmatprep.subr.mxu0 %v2495_v25  ;;  %2279 = vmatpush3.msra.mxu1 %v1389_v41  ;;  %v1374_v41 = vld [vmem:[#allocation5 + $0xc80] sm:$0xff] }
  0xed   :  { %2248 = vmatpush3.msra.mxu0 %v1300_v27  ;;  %2280 = vmatprep.subr.mxu1 %v2495_v25 }
  0xee   :  { %2249 = vmatprep.subr.mxu0 %v2495_v25  ;;  %2281 = vmatpush3.msra.mxu1 %v1388_v42  ;;  %v1476_v42 = vld [vmem:[#allocation5 + $0xd78] sm:$0xff] }
  0xef   :  { %2250 = vmatpush3.msra.mxu0 %v1299_v28  ;;  %2282 = vmatprep.subr.mxu1 %v2495_v25 }
  0xf0   :  { %2251 = vmatprep.subr.mxu0 %v2495_v25  ;;  %2283 = vmatpush3.msra.mxu1 %v1387_v43  ;;  %v1475_v43 = vld [vmem:[#allocation5 + $0xd70] sm:$0xff] }
  0xf1   :  { %2252 = vmatpush3.msra.mxu0 %v1298_v29  ;;  %2284 = vmatprep.subr.mxu1 %v2495_v25 }
  0xf2   :  { %2253 = vmatprep.subr.mxu0 %v2495_v25  ;;  %2285 = vmatpush3.msra.mxu1 %v1386_v44  ;;  %v1474_v44 = vld [vmem:[#allocation5 + $0xd68] sm:$0xff] }
  0xf3   :  { %2254 = vmatpush3.msra.mxu0 %v1297_v30  ;;  %2286 = vmatprep.subr.mxu1 %v2495_v25 }
  0xf4   :  { %2255 = vmatprep.subr.mxu0 %v2495_v25  ;;  %2287 = vmatpush3.msra.mxu1 %v1385_v45  ;;  %v1473_v45 = vld [vmem:[#allocation5 + $0xd60] sm:$0xff] }
  0xf5   :  { %2256 = vmatpush3.msra.mxu0 %v1296_v31  ;;  %2288 = vmatprep.subr.mxu1 %v2495_v25 }
  0xf6   :  { %2257 = vmatprep.subr.mxu0 %v2495_v25  ;;  %2289 = vmatpush3.msra.mxu1 %v1384_v46  ;;  %v1472_v46 = vld [vmem:[#allocation5 + $0xd58] sm:$0xff] }
  0xf7   :  { %2258 = vmatpush3.msra.mxu0 %v1295_v32  ;;  %2290 = vmatprep.subr.mxu1 %v2495_v25 }
  0xf8   :  { %2259 = vmatprep.subr.mxu0 %v2495_v25  ;;  %2291 = vmatpush3.msra.mxu1 %v1383_v47  ;;  %v1471_v47 = vld [vmem:[#allocation5 + $0xd50] sm:$0xff] }
  0xf9   :  { %2260 = vmatpush3.msra.mxu0 %v1294_v33  ;;  %2292 = vmatprep.subr.mxu1 %v2495_v25 }
  0xfa   :  { %2261 = vmatprep.subr.mxu0 %v2495_v25  ;;  %2293 = vmatpush3.msra.mxu1 %v1382_v48  ;;  %v1470_v48 = vld [vmem:[#allocation5 + $0xd48] sm:$0xff] }
  0xfb   :  { %2262 = vmatpush3.msra.mxu0 %v1293_v34  ;;  %2294 = vmatprep.subr.mxu1 %v2495_v25 }
  0xfc   :  { %2263 = vmatprep.subr.mxu0 %v2495_v25  ;;  %2295 = vmatpush3.msra.mxu1 %v1381_v49  ;;  %v1469_v49 = vld [vmem:[#allocation5 + $0xd40] sm:$0xff] }
  0xfd   :  { %2264 = vmatpush3.msra.mxu0 %v1292_v35  ;;  %2296 = vmatprep.subr.mxu1 %v2495_v25  ;;  %v1770_v55 = vpop.f32.mrf.mxu0 }
  0xfe   :  { %2265 = vmatprep.subr.mxu0 %v2495_v25  ;;  %2297 = vmatpush3.msra.mxu1 %v1380_v50  ;;  %v1805_v56 = vpop.f32.mrf.mxu1  ;;  %v1468_v50 = vld [vmem:[#allocation5 + $0xd38] sm:$0xff] }
  0xff   :  { %2266 = vmatpush3.msra.mxu0 %v1291_v36  ;;  %2298 = vmatprep.subr.mxu1 %v2495_v25  ;;  %v1771_v57 = vpop.f32.mrf.mxu0 }
 0x100   :  { %2267 = vmatprep.subr.mxu0 %v2495_v25  ;;  %2299 = vmatpush3.msra.mxu1 %v1379_v51  ;;  %v1806_v59 = vpop.f32.mrf.mxu1  ;;  %v1772_v62 = vadd.f32 %v1771_v57, %v1770_v55  ;;  %v1467_v51 = vld [vmem:[#allocation5 + $0xd30] sm:$0xff] }
 0x101   :  { %2268 = vmatpush3.msra.mxu0 %v1290_v37  ;;  %2300 = vmatprep.subr.mxu1 %v2495_v25  ;;  %v1807_v63 = vadd.f32 %v1806_v59, %v1805_v56  ;;  %v1463_v55 = vld [vmem:[#allocation5 + $0xd10] sm:$0xff]  ;;  %v1462_v59 = vld [vmem:[#allocation5 + $0xd08] sm:$0xff] }
 0x102   :  { %2269 = vmatprep.subr.mxu0 %v2495_v25  ;;  %2301 = vmatpush3.msra.mxu1 %v1378_v52  ;;  %v1466_v52 = vld [vmem:[#allocation5 + $0xd28] sm:$0xff] }
 0x103   :  { %2270 = vmatpush3.msra.mxu0 %v1289_v38  ;;  %2302 = vmatprep.subr.mxu1 %v2495_v25  ;;  %v583_v3 = vadd.f32 %v1807_v63, %v1772_v62  ;;  %v1562_v62 = vld [vmem:[#allocation5 + $0xdf0] sm:$0xff]  ;;  %v1561_v63 = vld [vmem:[#allocation5 + $0xde8] sm:$0xff] }
 0x104   :  { %2271 = vmatprep.subr.mxu0 %v2495_v25  ;;  %2303 = vmatpush3.msra.mxu1 %v1377_v53  ;;  %v1465_v53 = vld [vmem:[#allocation5 + $0xd20] sm:$0xff] }
 0x105   :  { %2272 = vmatpush3.msra.mxu0 %v1288_v39  ;;  %2304 = vmatprep.subr.mxu1 %v2495_v25 }
 0x106   :  { %2273 = vmatprep.subr.mxu0 %v2495_v25  ;;  %2305 = vmatpush3.msra.mxu1 %v1376_v54  ;;  %v1464_v54 = vld [vmem:[#allocation5 + $0xd18] sm:$0xff] }
 0x107   :  { %2274 = vmatpush3.msra.mxu0 %v1287_v40  ;;  %2306 = vmatprep.subr.mxu1 %v2495_v25  ;;  %v1375_v40 = vld [vmem:[#allocation5 + $0xc88] sm:$0xff] }
 0x108   :  { %2313 = vmatprep.subr.mxu0 %v2495_v25  ;;  %2307 = vmatpush3.msra.mxu1 %v1375_v40 }
 0x109   :  { %2308 = vmatprep.subr.mxu1 %v2495_v25 }
 0x10a   :  { %2309 = vmatpush3.msra.mxu1 %v1374_v41 }
 0x10b   :  { %2348 = vmatprep.subr.mxu1 %v2495_v25 }
 0x11f   :  { %v1840_v58 = vpop.f32.mrf.mxu0 }
 0x121   :  { %v1875_v60 = vpop.f32.mrf.mxu1  ;;  %v1841_v61 = vpop.f32.mrf.mxu0 }
 0x122   :  { %v1842_v1 = vadd.f32 %v1841_v61, %v1840_v58  ;;  %v1563_v61 = vld [vmem:[#allocation5 + $0xdf8] sm:$0xff] }
 0x123   :  { %v1876_v2 = vpop.f32.mrf.mxu1 }
 0x124   :  { %v653_v6 = vadd.f32 %v1842_v1, %v583_v3  ;;  %v1877_v7 = vadd.f32 %v1876_v2, %v1875_v60  ;;  %v1461_v60 = vld [vmem:[#allocation5 + $0xd00] sm:$0xff]  ;;  %v1559_v1 = vld [vmem:[#allocation5 + $0xdd8] sm:$0xff]  ;;  %v1558_v2 = vld [vmem:[#allocation5 + $0xdd0] sm:$0xff] }
 0x125   :  { %v1557_v3 = vld [vmem:[#allocation5 + $0xdc8] sm:$0xff] }
 0x126   :  { %v723_v11 = vadd.f32 %v1877_v7, %v653_v6  ;;  %v1554_v6 = vld [vmem:[#allocation5 + $0xdb0] sm:$0xff]  ;;  %v1553_v7 = vld [vmem:[#allocation5 + $0xda8] sm:$0xff] }
 0x141   :  { %v1910_v0 = vpop.f32.mrf.mxu0 }
 0x143   :  { %v1945_v4 = vpop.f32.mrf.mxu1  ;;  %v1911_v5 = vpop.f32.mrf.mxu0 }
 0x144   :  { %v1912_v9 = vadd.f32 %v1911_v5, %v1910_v0  ;;  %v1560_v0 = vld [vmem:[#allocation5 + $0xde0] sm:$0xff]  ;;  %v1555_v5 = vld [vmem:[#allocation5 + $0xdb8] sm:$0xff] }
 0x145   :  { %v1946_v10 = vpop.f32.mrf.mxu1 }
 0x146   :  { %v793_v14 = vadd.f32 %v1912_v9, %v723_v11  ;;  %v1947_v15 = vadd.f32 %v1946_v10, %v1945_v4  ;;  %v1556_v4 = vld [vmem:[#allocation5 + $0xdc0] sm:$0xff]  ;;  %v1551_v9 = vld [vmem:[#allocation5 + $0xd98] sm:$0xff]  ;;  %v1550_v10 = vld [vmem:[#allocation5 + $0xd90] sm:$0xff] }
 0x148   :  { %v863_v19 = vadd.f32 %v1947_v15, %v793_v14  ;;  %v1549_v14 = vld [vmem:[#allocation5 + $0xd88] sm:$0xff]  ;;  %v1548_v15 = vld [vmem:[#allocation5 + $0xd80] sm:$0xff] }
 0x163   :  { %v1980_v8 = vpop.f32.mrf.mxu0 }
 0x165   :  { %v2015_v12 = vpop.f32.mrf.mxu1  ;;  %v1981_v13 = vpop.f32.mrf.mxu0 }
 0x166   :  { %v1982_v17 = vadd.f32 %v1981_v13, %v1980_v8  ;;  %v1552_v8 = vld [vmem:[#allocation5 + $0xda0] sm:$0xff] }
 0x167   :  { %v2016_v18 = vpop.f32.mrf.mxu1 }
 0x168   :  { %v933_v22 = vadd.f32 %v1982_v17, %v863_v19  ;;  %v2017_v23 = vadd.f32 %v2016_v18, %v2015_v12  ;;  %v1649_v17 = vld [vmem:[#allocation5 + $0xe70] sm:$0xff]  ;;  %v1648_v18 = vld [vmem:[#allocation5 + $0xe68] sm:$0xff]  ;;  %v1647_v19 = vld [vmem:[#allocation5 + $0xe60] sm:$0xff] }
 0x16a   :  { %v1003_v27 = vadd.f32 %v2017_v23, %v933_v22  ;;  %v1644_v22 = vld [vmem:[#allocation5 + $0xe48] sm:$0xff]  ;;  %v1643_v23 = vld [vmem:[#allocation5 + $0xe40] sm:$0xff] }
 0x185   :  { %v2050_v16 = vpop.f32.mrf.mxu0 }
 0x187   :  { %v2085_v20 = vpop.f32.mrf.mxu1  ;;  %v2051_v21 = vpop.f32.mrf.mxu0 }
 0x188   :  { %v2052_v24 = vadd.f32 %v2051_v21, %v2050_v16  ;;  %v1650_v16 = vld [vmem:[#allocation5 + $0xe78] sm:$0xff]  ;;  %v1645_v21 = vld [vmem:[#allocation5 + $0xe50] sm:$0xff] }
 0x189   :  { %v2086_v26 = vpop.f32.mrf.mxu1 }
 0x18a   :  { %v1073_v28 = vadd.f32 %v2052_v24, %v1003_v27  ;;  %v2087_v29 = vadd.f32 %v2086_v26, %v2085_v20  ;;  %v1646_v20 = vld [vmem:[#allocation5 + $0xe58] sm:$0xff]  ;;  %v1641_v26 = vld [vmem:[#allocation5 + $0xe30] sm:$0xff]  ;;  %v1640_v27 = vld [vmem:[#allocation5 + $0xe28] sm:$0xff] }
 0x18b   :  { %v1642_v24 = vld [vmem:[#allocation5 + $0xe38] sm:$0xff] }
 0x18c   :  { %v1143_v34 = vadd.f32 %v2087_v29, %v1073_v28  ;;  %v1639_v28 = vld [vmem:[#allocation5 + $0xe20] sm:$0xff]  ;;  %v1638_v29 = vld [vmem:[#allocation5 + $0xe18] sm:$0xff] }
 0x1a7   :  { %v2120_v30 = vpop.f32.mrf.mxu0 }
 0x1a8   :  { %v2155_v31 = vpop.f32.mrf.mxu1 }
 0x1a9   :  { %v2121_v32 = vpop.f32.mrf.mxu0 }
 0x1aa   :  { %v2156_v33 = vpop.f32.mrf.mxu1  ;;  %v2122_v35 = vadd.f32 %v2121_v32, %v2120_v30  ;;  %v1637_v30 = vld [vmem:[#allocation5 + $0xe10] sm:$0xff] }
 0x1ab   :  { %v2157_v37 = vadd.f32 %v2156_v33, %v2155_v31 }
 0x1ac   :  { %v1213_v36 = vadd.f32 %v2122_v35, %v1143_v34  ;;  %v1636_v34 = vld [vmem:[#allocation5 + $0xe08] sm:$0xff]  ;;  %v1635_v35 = vld [vmem:[#allocation5 + $0xe00] sm:$0xff] }
 0x1ae   :  { %v1283_v38 = vadd.f32 %v2157_v37, %v1213_v36 }
 0x1b0   :  { %v1286_v39 = vmax.f32 %v1283_v38, 0.0 }
 0x1b2   :  { %2276 = vmatmul.mubr.f32.vlgmr.msra.gmra.mxu0 %v1286_v39 }
 0x1b3   :  { %2345 = vmatprep.mubr.msk.f32.mxu0 %vm2496_vm0, %v2495_v25  ;;  %2314 = vmatpush3.msra.mxu0 %v1476_v42 }
 0x1b4   :  { %2315 = vmatprep.subr.mxu0 %v2495_v25 }
 0x1b5   :  { %2316 = vmatpush3.msra.mxu0 %v1475_v43 }
 0x1b6   :  { %2317 = vmatprep.subr.mxu0 %v2495_v25 }
 0x1b7   :  { %2318 = vmatpush3.msra.mxu0 %v1474_v44 }
 0x1b8   :  { %2319 = vmatprep.subr.mxu0 %v2495_v25 }
 0x1b9   :  { %2320 = vmatpush3.msra.mxu0 %v1473_v45 }
 0x1ba   :  { %2321 = vmatprep.subr.mxu0 %v2495_v25 }
 0x1bb   :  { %2322 = vmatpush3.msra.mxu0 %v1472_v46 }
 0x1bc   :  { %2323 = vmatprep.subr.mxu0 %v2495_v25 }
 0x1bd   :  { %2324 = vmatpush3.msra.mxu0 %v1471_v47 }
 0x1be   :  { %2325 = vmatprep.subr.mxu0 %v2495_v25 }
 0x1bf   :  { %2326 = vmatpush3.msra.mxu0 %v1470_v48 }
 0x1c0   :  { %2327 = vmatprep.subr.mxu0 %v2495_v25 }
 0x1c1   :  { %2328 = vmatpush3.msra.mxu0 %v1469_v49 }
 0x1c2   :  { %2329 = vmatprep.subr.mxu0 %v2495_v25 }
 0x1c3   :  { %2330 = vmatpush3.msra.mxu0 %v1468_v50 }
 0x1c4   :  { %2331 = vmatprep.subr.mxu0 %v2495_v25 }
 0x1c5   :  { %2332 = vmatpush3.msra.mxu0 %v1467_v51 }
 0x1c6   :  { %2333 = vmatprep.subr.mxu0 %v2495_v25 }
 0x1c7   :  { %2334 = vmatpush3.msra.mxu0 %v1466_v52 }
 0x1c8   :  { %2335 = vmatprep.subr.mxu0 %v2495_v25 }
 0x1c9   :  { %2336 = vmatpush3.msra.mxu0 %v1465_v53 }
 0x1ca   :  { %2337 = vmatprep.subr.mxu0 %v2495_v25 }
 0x1cb   :  { %2338 = vmatpush3.msra.mxu0 %v1464_v54 }
 0x1cc   :  { %2339 = vmatprep.subr.mxu0 %v2495_v25 }
 0x1cd   :  { %2340 = vmatpush3.msra.mxu0 %v1463_v55 }
 0x1ce   :  { %2341 = vmatprep.subr.mxu0 %v2495_v25 }
 0x1cf   :  { %2342 = vmatpush3.msra.mxu0 %v1462_v59 }
 0x1d0   :  { %2343 = vmatprep.subr.mxu0 %v2495_v25 }
 0x1d1   :  { %2344 = vmatpush3.msra.mxu0 %v1461_v60 }
 0x1d2   :  { %2383 = vmatprep.subr.mxu0 %v2495_v25 }
 0x272   :  { %v1369_v56 = vpop.f32.mrf.mxu0 }
 0x273   :  { %v1373_v57 = vmax.f32 %v1369_v56, 0.0 }
 0x274   :  { %v2277_v58 = vpop.f32.mrf.mxu0 }
 0x275   :  { %2311 = vmatmul.mubr.f32.vlgmr.msra.gmra.mxu1 %v1373_v57 }
 0x276   :  { %2380 = vmatprep.mubr.msk.f32.mxu1 %vm2496_vm0, %v2495_v25  ;;  %2349 = vmatpush3.msra.mxu1 %v1563_v61 }
 0x277   :  { %2350 = vmatprep.subr.mxu1 %v2495_v25 }
 0x278   :  { %2351 = vmatpush3.msra.mxu1 %v1562_v62 }
 0x279   :  { %2352 = vmatprep.subr.mxu1 %v2495_v25 }
 0x27a   :  { %2353 = vmatpush3.msra.mxu1 %v1561_v63 }
 0x27b   :  { %2354 = vmatprep.subr.mxu1 %v2495_v25 }
 0x27c   :  { %2355 = vmatpush3.msra.mxu1 %v1560_v0 }
 0x27d   :  { %2356 = vmatprep.subr.mxu1 %v2495_v25 }
 0x27e   :  { %2357 = vmatpush3.msra.mxu1 %v1559_v1 }
 0x27f   :  { %2358 = vmatprep.subr.mxu1 %v2495_v25 }
 0x280   :  { %2359 = vmatpush3.msra.mxu1 %v1558_v2 }
 0x281   :  { %2360 = vmatprep.subr.mxu1 %v2495_v25 }
 0x282   :  { %2361 = vmatpush3.msra.mxu1 %v1557_v3 }
 0x283   :  { %2362 = vmatprep.subr.mxu1 %v2495_v25 }
 0x284   :  { %2363 = vmatpush3.msra.mxu1 %v1556_v4 }
 0x285   :  { %2364 = vmatprep.subr.mxu1 %v2495_v25 }
 0x286   :  { %2365 = vmatpush3.msra.mxu1 %v1555_v5 }
 0x287   :  { %2366 = vmatprep.subr.mxu1 %v2495_v25 }
 0x288   :  { %2367 = vmatpush3.msra.mxu1 %v1554_v6 }
 0x289   :  { %2368 = vmatprep.subr.mxu1 %v2495_v25 }
 0x28a   :  { %2369 = vmatpush3.msra.mxu1 %v1553_v7 }
 0x28b   :  { %2370 = vmatprep.subr.mxu1 %v2495_v25 }
 0x28c   :  { %2371 = vmatpush3.msra.mxu1 %v1552_v8 }
 0x28d   :  { %2372 = vmatprep.subr.mxu1 %v2495_v25 }
 0x28e   :  { %2373 = vmatpush3.msra.mxu1 %v1551_v9 }
 0x28f   :  { %2374 = vmatprep.subr.mxu1 %v2495_v25 }
 0x290   :  { %2375 = vmatpush3.msra.mxu1 %v1550_v10 }
 0x291   :  { %2376 = vmatprep.subr.mxu1 %v2495_v25 }
 0x292   :  { %2377 = vmatpush3.msra.mxu1 %v1549_v14 }
 0x293   :  { %2378 = vmatprep.subr.mxu1 %v2495_v25 }
 0x294   :  { %2379 = vmatpush3.msra.mxu1 %v1548_v15 }
 0x335   :  { %v1456_v11 = vpop.f32.mrf.mxu1 }
 0x336   :  { %v1460_v12 = vmax.f32 %v1456_v11, 0.0 }
 0x337   :  { %v2312_v13 = vpop.f32.mrf.mxu1 }
 0x338   :  { %2346 = vmatmul.mubr.f32.vlgmr.msra.gmra.mxu0 %v1460_v12 }
 0x339   :  { %2415 = vmatprep.mubr.msk.f32.mxu0 %vm2496_vm0, %v2495_v25  ;;  %2384 = vmatpush3.msra.mxu0 %v1650_v16 }
 0x33a   :  { %2385 = vmatprep.subr.mxu0 %v2495_v25 }
 0x33b   :  { %2386 = vmatpush3.msra.mxu0 %v1649_v17 }
 0x33c   :  { %2387 = vmatprep.subr.mxu0 %v2495_v25 }
 0x33d   :  { %2388 = vmatpush3.msra.mxu0 %v1648_v18 }
 0x33e   :  { %2389 = vmatprep.subr.mxu0 %v2495_v25 }
 0x33f   :  { %2390 = vmatpush3.msra.mxu0 %v1647_v19 }
 0x340   :  { %2391 = vmatprep.subr.mxu0 %v2495_v25 }
 0x341   :  { %2392 = vmatpush3.msra.mxu0 %v1646_v20 }
 0x342   :  { %2393 = vmatprep.subr.mxu0 %v2495_v25 }
 0x343   :  { %2394 = vmatpush3.msra.mxu0 %v1645_v21 }
 0x344   :  { %2395 = vmatprep.subr.mxu0 %v2495_v25 }
 0x345   :  { %2396 = vmatpush3.msra.mxu0 %v1644_v22 }
 0x346   :  { %2397 = vmatprep.subr.mxu0 %v2495_v25 }
 0x347   :  { %2398 = vmatpush3.msra.mxu0 %v1643_v23 }
 0x348   :  { %2399 = vmatprep.subr.mxu0 %v2495_v25 }
 0x349   :  { %2400 = vmatpush3.msra.mxu0 %v1642_v24 }
 0x34a   :  { %2401 = vmatprep.subr.mxu0 %v2495_v25 }
 0x34b   :  { %2402 = vmatpush3.msra.mxu0 %v1641_v26 }
 0x34c   :  { %2403 = vmatprep.subr.mxu0 %v2495_v25 }
 0x34d   :  { %2404 = vmatpush3.msra.mxu0 %v1640_v27 }
 0x34e   :  { %2405 = vmatprep.subr.mxu0 %v2495_v25 }
 0x34f   :  { %2406 = vmatpush3.msra.mxu0 %v1639_v28 }
 0x350   :  { %2407 = vmatprep.subr.mxu0 %v2495_v25 }
 0x351   :  { %2408 = vmatpush3.msra.mxu0 %v1638_v29 }
 0x352   :  { %2409 = vmatprep.subr.mxu0 %v2495_v25 }
 0x353   :  { %2410 = vmatpush3.msra.mxu0 %v1637_v30 }
 0x354   :  { %2411 = vmatprep.subr.mxu0 %v2495_v25 }
 0x355   :  { %2412 = vmatpush3.msra.mxu0 %v1636_v34 }
 0x356   :  { %2413 = vmatprep.subr.mxu0 %v2495_v25 }
 0x357   :  { %2414 = vmatpush3.msra.mxu0 %v1635_v35 }
 0x3f8   :  { %v1543_v31 = vpop.f32.mrf.mxu0 }
 0x3f9   :  { %v1547_v32 = vmax.f32 %v1543_v31, 0.0 }
 0x3fa   :  { %v2347_v33 = vpop.f32.mrf.mxu0 }
 0x3fb   :  { %2381 = vmatmul.mubr.f32.vlgmr.msra.gmra.mxu1 %v1547_v32 }
 0x4bb   :  { %v1630_v36 = vpop.f32.mrf.mxu1 }
 0x4bc   :  { %v1634_v37 = vmax.f32 %v1630_v36, 0.0 }
 0x4bd   :  { %v2382_v38 = vpop.f32.mrf.mxu1 }
 0x4be   :  { %2416 = vmatmul.mubr.f32.vlgmr.msra.gmra.mxu0 %v1634_v37 }
 0x57e   :  { %v1717_v39 = vpop.f32.mrf.mxu0 }
 0x57f   :  { %1721 = vst [vmem:[#allocation7] sm:$0xff] %v1717_v39 }
 0x580   :  { %v2417_v40 = vpop.f32.mrf.mxu0 }
 0x581   :  { %2476 = shalt.err (!%p2473_p0)
}
 0x582   :  { %1731 = dma.vmem_to_hbm [thread:$0]  %s1729_s1, 128, %s2614_s2, [#allocation4]  }
 0x583   :  { %2489 = dma.done.wait [#allocation4], 128  }
 0x584   :  { %2490 = vsyncadd [#allocation4], 4294967168 }
 0x585   :  { %1735 = vsyncpa [#allocation3], 1 }
 0x586   :  { %1736 = vsyncpa [#allocation6], 1 }
 0x587   :  { %1737 = vsyncpa [#allocation4], 1 }

</bundles_post_ra>
